<compile_context>
chip_gen: v7x
topology: tpu7x:2x2x1
jax: 0.10.0
libtpu: 0.0.40
codegen_flags: <defaults>
</compile_context>

<pallas_src>
import jax
import jax.numpy as jnp
from jax.experimental import pallas as pl
from jax.experimental.pallas import tpu as pltpu

# ---- static config -----------------------------------------------------------
N_ATOMS = 8                 # atoms per molecule (dense-padded)
ATOM_FDIM = 16              # atom feature dim
HIDDEN = 128                # args.hidden_size (MPN hidden) -- lane-dense
FFN_HIDDEN = 128            # args.ffn_hidden_size          -- lane-dense
OUT = 1                     # args.num_tasks
OUT_PAD = 128               # lane-dense padded output width
DEPTH = 3                   # MPN message passing depth

MOLS_PER_GROUP = 32                       # 32 mols * 8 atoms = 256 atoms/group
APG = MOLS_PER_GROUP * N_ATOMS            # atoms per group (MXU M/K dim = 256)
NUM_GROUPS = 4                            # grid size
TOTAL_MOLS = MOLS_PER_GROUP * NUM_GROUPS  # 128 molecules
TOTAL_ATOMS = TOTAL_MOLS * N_ATOMS        # 1024 atoms


# ---- fused kernel: MPN surrogate + masked-mean readout + Tconcat + ffn_A -----
def fused_kernel(x_ref, adj_ref, pool_ref, cnt_ref, t_ref,
                 wi_ref, bi_ref, wh_ref,
                 w1h_ref, w1t_ref, b1_ref, w2_ref, b2_ref,
                 out_ref):
    # Per-group blocks (pipelined):          weights (bf16, VMEM-resident):
    #   x_ref    (APG, ATOM_FDIM) bf16         wi  (ATOM_FDIM, HIDDEN)
    #   adj_ref  (1, APG, APG)    bf16         wh  (HIDDEN, HIDDEN)
    #   pool_ref (1, M, APG)      bf16 0/1     w1h (HIDDEN, FFN_HIDDEN)
    #   cnt_ref  (1, M, 1)        f32          w2  (FFN_HIDDEN, OUT_PAD)
    #   t_ref    (1, M, 1)        f32        biases / w1t stay f32.
    x = x_ref[...]
    adj = adj_ref[0]
    wi = wi_ref[...]
    wh = wh_ref[...]
    bi = bi_ref[...]

    # MPN surrogate over all atoms of the group at once (bf16 MXU, f32 acc).
    h0 = jnp.maximum(
        jnp.dot(x, wi, preferred_element_type=jnp.float32) + bi, 0.0)   # (APG,H)
    h = h0
    for _ in range(DEPTH):  # static unroll
        m = jnp.dot(adj, h.astype(jnp.bfloat16),
                    preferred_element_type=jnp.float32)                 # (APG,H)
        h = jnp.maximum(
            h0 + jnp.dot(m.astype(jnp.bfloat16), wh,
                         preferred_element_type=jnp.float32), 0.0)

    # Masked-SUM readout with an exact 0/1 bf16 pool matrix, then exact-count
    # f32 reciprocal scaling (EUP slot, effectively free): (M, H).
    mol = jnp.dot(pool_ref[0], h.astype(jnp.bfloat16),
                  preferred_element_type=jnp.float32)
    mol = mol * pl.reciprocal(cnt_ref[0], approx=True)

    # ffn_A with the Tconcat column folded in as a rank-1 update:
    #   cat([mol, T], 1) @ W1 == mol @ W1[:H, :] + T * W1[H:H+1, :]
    z = jnp.dot(mol.astype(jnp.bfloat16), w1h_ref[...],
                preferred_element_type=jnp.float32)
    z = jnp.maximum(z + t_ref[0] * w1t_ref[...] + b1_ref[...], 0.0)     # (M,F)

    # Lane-dense output block (M, OUT_PAD); real prediction is column 0.
    out_ref[...] = (jnp.dot(z.astype(jnp.bfloat16), w2_ref[...],
                            preferred_element_type=jnp.float32) + b2_ref[...])


# ---- full forward ------------------------------------------------------------
@jax.jit
def molecule_model_forward(params, x, adj, atom_mask, T_batch):
    """x: (B,N,ATOM_FDIM), adj: (B,N,N), atom_mask: (B,N), T_batch: (B,)."""
    G, M, N = NUM_GROUPS, MOLS_PER_GROUP, N_ATOMS

    x_flat = x.reshape(TOTAL_ATOMS, ATOM_FDIM).astype(jnp.bfloat16)

    # Per-group block-diagonal adjacency (G, APG, APG):
    #   adj_bd[g, m*N+i, m2*N+j] = (m == m2) * adj[g*M+m, i, j]
    adj_r = adj.reshape(G, M, N, N)
    eye_m = jnp.eye(M, dtype=jnp.float32)
    adj_bd = (eye_m[None, :, None, :, None] * adj_r[:, :, :, None, :]
              ).reshape(G, APG, APG).astype(jnp.bfloat16)

    # Per-group 0/1 readout matrix (G, M, APG): pool[g, m, m*N+i] = mask[g,m,i]
    mask_r = atom_mask.reshape(G, M, N)
    pool01 = (eye_m[None, :, :, None] * mask_r[:, None, :, :]
              ).reshape(G, M, APG).astype(jnp.bfloat16)

    # Exact atom counts (f32) for the in-kernel reciprocal scale.
    counts = jnp.maximum(mask_r.sum(axis=-1, keepdims=True), 1.0)       # (G,M,1)
    t_g = T_batch.reshape(G, M, 1)

    out_pad = pl.pallas_call(
        fused_kernel,
        out_shape=jax.ShapeDtypeStruct((TOTAL_MOLS, OUT_PAD), jnp.float32),
        grid=(NUM_GROUPS,),
        in_specs=[
            # per-group, pipelined
            pl.BlockSpec((APG, ATOM_FDIM), lambda g: (g, 0)),
            pl.BlockSpec((1, APG, APG), lambda g: (g, 0, 0)),
            pl.BlockSpec((1, MOLS_PER_GROUP, APG), lambda g: (g, 0, 0)),
            pl.BlockSpec((1, MOLS_PER_GROUP, 1), lambda g: (g, 0, 0)),
            pl.BlockSpec((1, MOLS_PER_GROUP, 1), lambda g: (g, 0, 0)),
            # weights: constant index_map -> VMEM-resident across grid steps
            pl.BlockSpec((ATOM_FDIM, HIDDEN), lambda g: (0, 0)),
            pl.BlockSpec((1, HIDDEN), lambda g: (0, 0)),
            pl.BlockSpec((HIDDEN, HIDDEN), lambda g: (0, 0)),
            pl.BlockSpec((HIDDEN, FFN_HIDDEN), lambda g: (0, 0)),
            pl.BlockSpec((1, FFN_HIDDEN), lambda g: (0, 0)),
            pl.BlockSpec((1, FFN_HIDDEN), lambda g: (0, 0)),
            pl.BlockSpec((FFN_HIDDEN, OUT_PAD), lambda g: (0, 0)),
            pl.BlockSpec((1, OUT_PAD), lambda g: (0, 0)),
        ],
        out_specs=pl.BlockSpec((MOLS_PER_GROUP, OUT_PAD), lambda g: (g, 0)),
        compiler_params=pltpu.CompilerParams(
            dimension_semantics=("parallel",)),
    )(x_flat, adj_bd, pool01, counts, t_g,
      params["w_i"], params["b_i"], params["w_h"],
      params["w1_h"], params["w1_t"], params["b1"],
      params["w2"], params["b2"])

    # dataset_type='regression': no sigmoid / multiclass softmax.
    return out_pad[:, :OUT]


def init_params(key):
    """Weights stored in bf16 once (no per-call casts); biases in f32."""
    ks = jax.random.split(key, 5)
    scale = 0.1  # stands in for xavier_normal in initialize_weights
    w2_f32 = scale * jax.random.normal(ks[3], (FFN_HIDDEN, OUT), jnp.float32)
    w2_pad = jnp.zeros((FFN_HIDDEN, OUT_PAD), jnp.float32).at[:, :OUT].set(w2_f32)
    return {
        "w_i": (scale * jax.random.normal(ks[0], (ATOM_FDIM, HIDDEN),
                                          jnp.float32)).astype(jnp.bfloat16),
        "b_i": jnp.zeros((1, HIDDEN), jnp.float32),
        "w_h": (scale * jax.random.normal(ks[1], (HIDDEN, HIDDEN),
                                          jnp.float32)).astype(jnp.bfloat16),
        # ffn_A first Linear split: rows [0:HIDDEN] act on the fingerprint,
        # the extra row (w1_t) acts on the Tconcat temperature column.
        "w1_h": (scale * jax.random.normal(ks[2], (HIDDEN, FFN_HIDDEN),
                                           jnp.float32)).astype(jnp.bfloat16),
        "w1_t": scale * jax.random.normal(ks[4], (1, FFN_HIDDEN), jnp.float32),
        "b1": jnp.zeros((1, FFN_HIDDEN), jnp.float32),
        "w2": w2_pad.astype(jnp.bfloat16),            # lane-dense padded
        "b2": jnp.zeros((1, OUT_PAD), jnp.float32),
    }


if __name__ == "__main__":
    key = jax.random.PRNGKey(0)
    k_x, k_a, k_t, k_p = jax.random.split(key, 4)

    B = TOTAL_MOLS
    # Deterministic varying real-atom counts to exercise the masked readout.
    n_real = 4 + (jnp.arange(B, dtype=jnp.int32) % 5)                 # 4..8
    atom_mask = (jnp.arange(N_ATOMS)[None, :] < n_real[:, None]).astype(jnp.float32)

    x = jax.random.normal(k_x, (B, N_ATOMS, ATOM_FDIM), jnp.float32)
    x = x * atom_mask[:, :, None]                                     # zero pads

    adj = jax.random.bernoulli(k_a, 0.4, (B, N_ATOMS, N_ATOMS)).astype(jnp.float32)
    adj = jnp.maximum(adj, jnp.transpose(adj, (0, 2, 1)))              # symmetric
    adj = adj * (1.0 - jnp.eye(N_ATOMS)[None])                         # no self-loop
    adj = adj * atom_mask[:, :, None] * atom_mask[:, None, :]          # mask pads

    T_batch = 300.0 + 50.0 * jax.random.uniform(k_t, (B,), jnp.float32)

    params = init_params(k_p)

    out = molecule_model_forward(params, x, adj, atom_mask, T_batch)
    out = jax.block_until_ready(out)
    assert out.shape == (B, OUT)
    print("KERNEL_OK")
</pallas_src>

<mosaic_0001>
module attributes {stable_mosaic.version = 11 : i64} {
  func.func @fused_kernel(%arg0: i32, %arg1: memref<256x16xbf16, #tpu.memory_space<vmem>>, %arg2: memref<1x256x256xbf16, #tpu.memory_space<vmem>>, %arg3: memref<1x32x256xbf16, #tpu.memory_space<vmem>>, %arg4: memref<1x32x1xf32, #tpu.memory_space<vmem>>, %arg5: memref<1x32x1xf32, #tpu.memory_space<vmem>>, %arg6: memref<16x128xbf16, #tpu.memory_space<vmem>>, %arg7: memref<1x128xf32, #tpu.memory_space<vmem>>, %arg8: memref<128x128xbf16, #tpu.memory_space<vmem>>, %arg9: memref<128x128xbf16, #tpu.memory_space<vmem>>, %arg10: memref<1x128xf32, #tpu.memory_space<vmem>>, %arg11: memref<1x128xf32, #tpu.memory_space<vmem>>, %arg12: memref<128x128xbf16, #tpu.memory_space<vmem>>, %arg13: memref<1x128xf32, #tpu.memory_space<vmem>>, %arg14: memref<32x128xf32, #tpu.memory_space<vmem>>) attributes {dimension_semantics = [#tpu.dimension_semantics<parallel>], iteration_bounds = array<i64: 4>, scalar_prefetch = 0 : i64, scratch_operands = 0 : i64, tpu.core_type = #tpu.core_type<tc>, window_params = [{transform_indices = @transform_0, window_bounds = array<i64: 256, 16>}, {transform_indices = @transform_1, window_bounds = array<i64: 1, 256, 256>}, {transform_indices = @transform_2, window_bounds = array<i64: 1, 32, 256>}, {transform_indices = @transform_3, window_bounds = array<i64: 1, 32, 1>}, {transform_indices = @transform_4, window_bounds = array<i64: 1, 32, 1>}, {pipeline_mode = #tpu.pipeline_mode<synchronous>, transform_indices = @transform_5, window_bounds = array<i64: 16, 128>}, {pipeline_mode = #tpu.pipeline_mode<synchronous>, transform_indices = @transform_6, window_bounds = array<i64: 1, 128>}, {pipeline_mode = #tpu.pipeline_mode<synchronous>, transform_indices = @transform_7, window_bounds = array<i64: 128, 128>}, {pipeline_mode = #tpu.pipeline_mode<synchronous>, transform_indices = @transform_8, window_bounds = array<i64: 128, 128>}, {pipeline_mode = #tpu.pipeline_mode<synchronous>, transform_indices = @transform_9, window_bounds = array<i64: 1, 128>}, {pipeline_mode = #tpu.pipeline_mode<synchronous>, transform_indices = @transform_10, window_bounds = array<i64: 1, 128>}, {pipeline_mode = #tpu.pipeline_mode<synchronous>, transform_indices = @transform_11, window_bounds = array<i64: 128, 128>}, {pipeline_mode = #tpu.pipeline_mode<synchronous>, transform_indices = @transform_12, window_bounds = array<i64: 1, 128>}, {transform_indices = @transform_13, window_bounds = array<i64: 32, 128>}]} {
    %c0 = arith.constant 0 : index
    %c0_0 = arith.constant 0 : index
    %0 = vector.load %arg1[%c0, %c0_0] : memref<256x16xbf16, #tpu.memory_space<vmem>>, vector<256x16xbf16>
    %c0_1 = arith.constant 0 : index
    %c0_2 = arith.constant 0 : index
    %c0_3 = arith.constant 0 : index
    %1 = vector.load %arg2[%c0_1, %c0_2, %c0_3] : memref<1x256x256xbf16, #tpu.memory_space<vmem>>, vector<1x256x256xbf16>
    %2 = vector.shape_cast %1 : vector<1x256x256xbf16> to vector<256x256xbf16>
    %c0_4 = arith.constant 0 : index
    %c0_5 = arith.constant 0 : index
    %3 = vector.load %arg6[%c0_4, %c0_5] : memref<16x128xbf16, #tpu.memory_space<vmem>>, vector<16x128xbf16>
    %c0_6 = arith.constant 0 : index
    %c0_7 = arith.constant 0 : index
    %4 = vector.load %arg8[%c0_6, %c0_7] : memref<128x128xbf16, #tpu.memory_space<vmem>>, vector<128x128xbf16>
    %c0_8 = arith.constant 0 : index
    %c0_9 = arith.constant 0 : index
    %5 = vector.load %arg7[%c0_8, %c0_9] : memref<1x128xf32, #tpu.memory_space<vmem>>, vector<1x128xf32>
    %cst = arith.constant dense<0.000000e+00> : vector<256x128xf32>
    %6 = tpu.matmul %0, %3, %cst {dimension_numbers = #tpu.dot_dimension_numbers<[1], [0], [0], [1], [0, 0, 1, 1], [], []>} : vector<256x16xbf16>, vector<16x128xbf16>, vector<256x128xf32> -> vector<256x128xf32>
    %7 = vector.broadcast %5 : vector<1x128xf32> to vector<256x128xf32>
    %8 = arith.addf %6, %7 : vector<256x128xf32>
    %cst_10 = arith.constant 0.000000e+00 : f32
    %9 = vector.broadcast %cst_10 : f32 to vector<256x128xf32>
    %10 = arith.maximumf %8, %9 : vector<256x128xf32>
    %11 = arith.truncf %10 : vector<256x128xf32> to vector<256x128xbf16>
    %cst_11 = arith.constant dense<0.000000e+00> : vector<256x128xf32>
    %12 = tpu.matmul %2, %11, %cst_11 {dimension_numbers = #tpu.dot_dimension_numbers<[1], [0], [0], [1], [0, 0, 1, 1], [], []>} : vector<256x256xbf16>, vector<256x128xbf16>, vector<256x128xf32> -> vector<256x128xf32>
    %13 = arith.truncf %12 : vector<256x128xf32> to vector<256x128xbf16>
    %cst_12 = arith.constant dense<0.000000e+00> : vector<256x128xf32>
    %14 = tpu.matmul %13, %4, %cst_12 {dimension_numbers = #tpu.dot_dimension_numbers<[1], [0], [0], [1], [0, 0, 1, 1], [], []>} : vector<256x128xbf16>, vector<128x128xbf16>, vector<256x128xf32> -> vector<256x128xf32>
    %15 = arith.addf %10, %14 : vector<256x128xf32>
    %cst_13 = arith.constant 0.000000e+00 : f32
    %16 = vector.broadcast %cst_13 : f32 to vector<256x128xf32>
    %17 = arith.maximumf %15, %16 : vector<256x128xf32>
    %18 = arith.truncf %17 : vector<256x128xf32> to vector<256x128xbf16>
    %cst_14 = arith.constant dense<0.000000e+00> : vector<256x128xf32>
    %19 = tpu.matmul %2, %18, %cst_14 {dimension_numbers = #tpu.dot_dimension_numbers<[1], [0], [0], [1], [0, 0, 1, 1], [], []>} : vector<256x256xbf16>, vector<256x128xbf16>, vector<256x128xf32> -> vector<256x128xf32>
    %20 = arith.truncf %19 : vector<256x128xf32> to vector<256x128xbf16>
    %cst_15 = arith.constant dense<0.000000e+00> : vector<256x128xf32>
    %21 = tpu.matmul %20, %4, %cst_15 {dimension_numbers = #tpu.dot_dimension_numbers<[1], [0], [0], [1], [0, 0, 1, 1], [], []>} : vector<256x128xbf16>, vector<128x128xbf16>, vector<256x128xf32> -> vector<256x128xf32>
    %22 = arith.addf %10, %21 : vector<256x128xf32>
    %cst_16 = arith.constant 0.000000e+00 : f32
    %23 = vector.broadcast %cst_16 : f32 to vector<256x128xf32>
    %24 = arith.maximumf %22, %23 : vector<256x128xf32>
    %25 = arith.truncf %24 : vector<256x128xf32> to vector<256x128xbf16>
    %cst_17 = arith.constant dense<0.000000e+00> : vector<256x128xf32>
    %26 = tpu.matmul %2, %25, %cst_17 {dimension_numbers = #tpu.dot_dimension_numbers<[1], [0], [0], [1], [0, 0, 1, 1], [], []>} : vector<256x256xbf16>, vector<256x128xbf16>, vector<256x128xf32> -> vector<256x128xf32>
    %27 = arith.truncf %26 : vector<256x128xf32> to vector<256x128xbf16>
    %cst_18 = arith.constant dense<0.000000e+00> : vector<256x128xf32>
    %28 = tpu.matmul %27, %4, %cst_18 {dimension_numbers = #tpu.dot_dimension_numbers<[1], [0], [0], [1], [0, 0, 1, 1], [], []>} : vector<256x128xbf16>, vector<128x128xbf16>, vector<256x128xf32> -> vector<256x128xf32>
    %29 = arith.addf %10, %28 : vector<256x128xf32>
    %cst_19 = arith.constant 0.000000e+00 : f32
    %30 = vector.broadcast %cst_19 : f32 to vector<256x128xf32>
    %31 = arith.maximumf %29, %30 : vector<256x128xf32>
    %c0_20 = arith.constant 0 : index
    %c0_21 = arith.constant 0 : index
    %c0_22 = arith.constant 0 : index
    %32 = vector.load %arg3[%c0_20, %c0_21, %c0_22] : memref<1x32x256xbf16, #tpu.memory_space<vmem>>, vector<1x32x256xbf16>
    %33 = vector.shape_cast %32 : vector<1x32x256xbf16> to vector<32x256xbf16>
    %34 = arith.truncf %31 : vector<256x128xf32> to vector<256x128xbf16>
    %cst_23 = arith.constant dense<0.000000e+00> : vector<32x128xf32>
    %35 = tpu.matmul %33, %34, %cst_23 {dimension_numbers = #tpu.dot_dimension_numbers<[1], [0], [0], [1], [0, 0, 1, 1], [], []>} : vector<32x256xbf16>, vector<256x128xbf16>, vector<32x128xf32> -> vector<32x128xf32>
    %c0_24 = arith.constant 0 : index
    %c0_25 = arith.constant 0 : index
    %c0_26 = arith.constant 0 : index
    %36 = vector.load %arg4[%c0_24, %c0_25, %c0_26] : memref<1x32x1xf32, #tpu.memory_space<vmem>>, vector<1x32x1xf32>
    %37 = vector.shape_cast %36 : vector<1x32x1xf32> to vector<32x1xf32>
    %38 = tpu.reciprocal %37 {approx = true} : vector<32x1xf32> -> vector<32x1xf32>
    %39 = vector.broadcast %38 : vector<32x1xf32> to vector<32x128xf32>
    %40 = arith.mulf %35, %39 : vector<32x128xf32>
    %41 = arith.truncf %40 : vector<32x128xf32> to vector<32x128xbf16>
    %c0_27 = arith.constant 0 : index
    %c0_28 = arith.constant 0 : index
    %42 = vector.load %arg9[%c0_27, %c0_28] : memref<128x128xbf16, #tpu.memory_space<vmem>>, vector<128x128xbf16>
    %cst_29 = arith.constant dense<0.000000e+00> : vector<32x128xf32>
    %43 = tpu.matmul %41, %42, %cst_29 {dimension_numbers = #tpu.dot_dimension_numbers<[1], [0], [0], [1], [0, 0, 1, 1], [], []>} : vector<32x128xbf16>, vector<128x128xbf16>, vector<32x128xf32> -> vector<32x128xf32>
    %c0_30 = arith.constant 0 : index
    %c0_31 = arith.constant 0 : index
    %c0_32 = arith.constant 0 : index
    %44 = vector.load %arg5[%c0_30, %c0_31, %c0_32] : memref<1x32x1xf32, #tpu.memory_space<vmem>>, vector<1x32x1xf32>
    %45 = vector.shape_cast %44 : vector<1x32x1xf32> to vector<32x1xf32>
    %c0_33 = arith.constant 0 : index
    %c0_34 = arith.constant 0 : index
    %46 = vector.load %arg10[%c0_33, %c0_34] : memref<1x128xf32, #tpu.memory_space<vmem>>, vector<1x128xf32>
    %47 = vector.broadcast %45 : vector<32x1xf32> to vector<32x128xf32>
    %48 = vector.broadcast %46 : vector<1x128xf32> to vector<32x128xf32>
    %49 = arith.mulf %47, %48 : vector<32x128xf32>
    %50 = arith.addf %43, %49 : vector<32x128xf32>
    %c0_35 = arith.constant 0 : index
    %c0_36 = arith.constant 0 : index
    %51 = vector.load %arg11[%c0_35, %c0_36] : memref<1x128xf32, #tpu.memory_space<vmem>>, vector<1x128xf32>
    %52 = vector.broadcast %51 : vector<1x128xf32> to vector<32x128xf32>
    %53 = arith.addf %50, %52 : vector<32x128xf32>
    %cst_37 = arith.constant 0.000000e+00 : f32
    %54 = vector.broadcast %cst_37 : f32 to vector<32x128xf32>
    %55 = arith.maximumf %53, %54 : vector<32x128xf32>
    %56 = arith.truncf %55 : vector<32x128xf32> to vector<32x128xbf16>
    %c0_38 = arith.constant 0 : index
    %c0_39 = arith.constant 0 : index
    %57 = vector.load %arg12[%c0_38, %c0_39] : memref<128x128xbf16, #tpu.memory_space<vmem>>, vector<128x128xbf16>
    %cst_40 = arith.constant dense<0.000000e+00> : vector<32x128xf32>
    %58 = tpu.matmul %56, %57, %cst_40 {dimension_numbers = #tpu.dot_dimension_numbers<[1], [0], [0], [1], [0, 0, 1, 1], [], []>} : vector<32x128xbf16>, vector<128x128xbf16>, vector<32x128xf32> -> vector<32x128xf32>
    %c0_41 = arith.constant 0 : index
    %c0_42 = arith.constant 0 : index
    %59 = vector.load %arg13[%c0_41, %c0_42] : memref<1x128xf32, #tpu.memory_space<vmem>>, vector<1x128xf32>
    %60 = vector.broadcast %59 : vector<1x128xf32> to vector<32x128xf32>
    %61 = arith.addf %58, %60 : vector<32x128xf32>
    %c0_43 = arith.constant 0 : index
    %c0_44 = arith.constant 0 : index
    %62 = vector.load %arg14[%c0_43, %c0_44] : memref<32x128xf32, #tpu.memory_space<vmem>>, vector<32x128xf32>
    tpu.vector_store %arg14[%c0_43, %c0_44], %61 {strides = array<i32>} : memref<32x128xf32, #tpu.memory_space<vmem>>, vector<32x128xf32>,
    return
  }
  func.func @transform_0(%arg0: i32) -> (i32, i32) {
    %c0_i32 = arith.constant 0 : i32
    %c0_i32_0 = arith.constant 0 : i32
    return %arg0, %c0_i32 : i32, i32
  }
  func.func @transform_1(%arg0: i32) -> (i32, i32, i32) {
    %c0_i32 = arith.constant 0 : i32
    %c0_i32_0 = arith.constant 0 : i32
    %c0_i32_1 = arith.constant 0 : i32
    return %arg0, %c0_i32, %c0_i32_0 : i32, i32, i32
  }
  func.func @transform_2(%arg0: i32) -> (i32, i32, i32) {
    %c0_i32 = arith.constant 0 : i32
    %c0_i32_0 = arith.constant 0 : i32
    %c0_i32_1 = arith.constant 0 : i32
    return %arg0, %c0_i32, %c0_i32_0 : i32, i32, i32
  }
  func.func @transform_3(%arg0: i32) -> (i32, i32, i32) {
    %c0_i32 = arith.constant 0 : i32
    %c0_i32_0 = arith.constant 0 : i32
    %c0_i32_1 = arith.constant 0 : i32
    return %arg0, %c0_i32, %c0_i32_0 : i32, i32, i32
  }
  func.func @transform_4(%arg0: i32) -> (i32, i32, i32) {
    %c0_i32 = arith.constant 0 : i32
    %c0_i32_0 = arith.constant 0 : i32
    %c0_i32_1 = arith.constant 0 : i32
    return %arg0, %c0_i32, %c0_i32_0 : i32, i32, i32
  }
  func.func @transform_5(%arg0: i32) -> (i32, i32) {
    %c0_i32 = arith.constant 0 : i32
    %c0_i32_0 = arith.constant 0 : i32
    %c0_i32_1 = arith.constant 0 : i32
    return %c0_i32, %c0_i32_0 : i32, i32
  }
  func.func @transform_6(%arg0: i32) -> (i32, i32) {
    %c0_i32 = arith.constant 0 : i32
    %c0_i32_0 = arith.constant 0 : i32
    %c0_i32_1 = arith.constant 0 : i32
    return %c0_i32, %c0_i32_0 : i32, i32
  }
  func.func @transform_7(%arg0: i32) -> (i32, i32) {
    %c0_i32 = arith.constant 0 : i32
    %c0_i32_0 = arith.constant 0 : i32
    %c0_i32_1 = arith.constant 0 : i32
    return %c0_i32, %c0_i32_0 : i32, i32
  }
  func.func @transform_8(%arg0: i32) -> (i32, i32) {
    %c0_i32 = arith.constant 0 : i32
    %c0_i32_0 = arith.constant 0 : i32
    %c0_i32_1 = arith.constant 0 : i32
    return %c0_i32, %c0_i32_0 : i32, i32
  }
  func.func @transform_9(%arg0: i32) -> (i32, i32) {
    %c0_i32 = arith.constant 0 : i32
    %c0_i32_0 = arith.constant 0 : i32
    %c0_i32_1 = arith.constant 0 : i32
    return %c0_i32, %c0_i32_0 : i32, i32
  }
  func.func @transform_10(%arg0: i32) -> (i32, i32) {
    %c0_i32 = arith.constant 0 : i32
    %c0_i32_0 = arith.constant 0 : i32
    %c0_i32_1 = arith.constant 0 : i32
    return %c0_i32, %c0_i32_0 : i32, i32
  }
  func.func @transform_11(%arg0: i32) -> (i32, i32) {
    %c0_i32 = arith.constant 0 : i32
    %c0_i32_0 = arith.constant 0 : i32
    %c0_i32_1 = arith.constant 0 : i32
    return %c0_i32, %c0_i32_0 : i32, i32
  }
  func.func @transform_12(%arg0: i32) -> (i32, i32) {
    %c0_i32 = arith.constant 0 : i32
    %c0_i32_0 = arith.constant 0 : i32
    %c0_i32_1 = arith.constant 0 : i32
    return %c0_i32, %c0_i32_0 : i32, i32
  }
  func.func @transform_13(%arg0: i32) -> (i32, i32) {
    %c0_i32 = arith.constant 0 : i32
    %c0_i32_0 = arith.constant 0 : i32
    return %arg0, %c0_i32 : i32, i32
  }
}

</mosaic_0001>

<bundles_post_ra>
// kernel: molecule_model_forward.1
= control target key start
LH: loop header
LB: loop body
LE: loop exit
PB: predicated region body
PF: predicated region fallthrough
CT: control target
= control target key end

     0   :  { %s3956_s25 = smov 0   ;;  %s4686_s0 = inlined_call_operand.vmem [shape: bf16[1024,16], index: 0, kind: input, shape index: {}]   ;;  %s4687_s1 = inlined_call_operand.vmem [shape: bf16[4,256,256], index: 1, kind: input, shape index: {}]   ;;  %s4688_s2 = inlined_call_operand.vmem [shape: bf16[4,32,256], index: 2, kind: input, shape index: {}]   ;;  %s4689_s3 = inlined_call_operand.vmem [shape: f32[4,32,1], index: 3, kind: input, shape index: {}]   ;;  %s4690_s4 = inlined_call_operand.vmem [shape: f32[4,32,1], index: 4, kind: input, shape index: {}]   ;;  %s4691_s5 = inlined_call_operand.vmem [shape: bf16[16,128], index: 5, kind: input, shape index: {}]   ;;  %s4692_s6 = inlined_call_operand.vmem [shape: f32[1,128], index: 6, kind: input, shape index: {}]   ;;  %s4693_s7 = inlined_call_operand.vmem [shape: bf16[128,128], index: 7, kind: input, shape index: {}]   ;;  %s4694_s8 = inlined_call_operand.vmem [shape: bf16[128,128], index: 8, kind: input, shape index: {}]   ;;  %s4695_s9 = inlined_call_operand.vmem [shape: f32[1,128], index: 9, kind: input, shape index: {}]   ;;  %s4696_s10 = inlined_call_operand.vmem [shape: f32[1,128], index: 10, kind: input, shape index: {}]   ;;  %s4697_s11 = inlined_call_operand.vmem [shape: bf16[128,128], index: 11, kind: input, shape index: {}]   ;;  %s4698_s12 = inlined_call_operand.vmem [shape: f32[1,128], index: 12, kind: input, shape index: {}]   ;;  %s4699_s13 = inlined_call_operand.vmem [shape: f32[128,128], index: 13, kind: output, shape index: {}]  }
   0x1 LB: > { %s3962_s26 = sadd.s32 4294967295, %s3883_s25   ;;  %p2924_p0 = scmp.ge.s32.totalorder %s3883_s25, 1  ;;  %s3883_s25 = sphi %s3956_s25, %s23_s25  }
   0x2   : > { %p428_p1 = scmp.lt.s32.totalorder %s3883_s25, 5 }
   0x4   : > { %p429_p2 = pnand %p2924_p0, %p428_p1 }
   0x6   : > { %432 = sbr.rel (%p429_p2) target bundleno = 2681 (0xa79), region = 72 }
   0xd   : > { %v3742_v0 = vld [vmem:[%s4691_s5] sm:$0xff]   ;;  %s2925_s29 = sshll.u32 %s3962_s26, 5  ;;  %vm700_vm0 = vcmask 130048   ;;  %p498_p4 = scmp.lt.s32.totalorder %s3962_s26, 3 }
   0xe   : > { %p493_p3 = scmp.lt.s32.totalorder %s2925_s29, 127  ;;  %3513 = vmatprep.subr.bf16.mxu0 %v3742_v0  ;;  %v4038_v34 = vld [vmem:[%s4692_s6] ss:$0 sm:$0xff] }
   0xf   : > { %3514 = vmatpush3.bf16.msra.mxu0 %v3742_v0  ;;  %s4009_s17 = scalar_select %p498_p4, %s3962_s26, 3 }
  0x10   : > { %s4804_s29 = smov (!%p493_p3, %s2925_s29), 127 }
  0x11   : > { %s2926_s30 = sshll.u32 %s4804_s29, 2  ;;  %s3036_s18 = sshll.u32 %s4009_s17, 8 }
  0x12   : > { %s3973_s16 = scalar_lea.vmem %s4686_s0, %s2926_s30  ;;  %s4015_s21 = scalar_lea.vmem %s4687_s1, %s3036_s18 }
  0x13   : > { %v3743_v1 = vld [vmem:[%s3973_s16] sm:$0xff]   ;;  %v3744_v2 = vld [vmem:[%s3973_s16 + $0x8] sm:$0xff]   ;;  %v3745_v3 = vld [vmem:[%s3973_s16 + $0x10] sm:$0xff]  }
  0x14   : > { %3515 = vmatprep.mubr.msk.bf16.mxu0 %vm700_vm0, %v3743_v1  ;;  %v3746_v4 = vld [vmem:[%s3973_s16 + $0x18] sm:$0xff]   ;;  %v3747_v5 = vld [vmem:[%s3973_s16 + $0x20] sm:$0xff]   ;;  %v3748_v6 = vld [vmem:[%s3973_s16 + $0x28] sm:$0xff]  }
  0x15   : > { %3516 = vmatmul.mubr.msk.bf16.vlgmr.msra.gmra.mrb[0].mxu0 %vm700_vm0, %v3744_v2  ;;  %v3749_v7 = vld [vmem:[%s3973_s16 + $0x30] sm:$0xff]   ;;  %v3750_v8 = vld [vmem:[%s3973_s16 + $0x38] sm:$0xff]   ;;  %v3751_v9 = vld [vmem:[%s3973_s16 + $0x40] sm:$0xff]  }
  0x16   : > { %3519 = vmatprep.mubr.msk.bf16.mxu0 %vm700_vm0, %v3745_v3  ;;  %v3752_v10 = vld [vmem:[%s3973_s16 + $0x48] sm:$0xff]   ;;  %v3753_v11 = vld [vmem:[%s3973_s16 + $0x50] sm:$0xff]   ;;  %v3754_v12 = vld [vmem:[%s3973_s16 + $0x58] sm:$0xff]  }
  0x17   : > { %v3755_v13 = vld [vmem:[%s3973_s16 + $0x60] sm:$0xff]   ;;  %v3756_v14 = vld [vmem:[%s3973_s16 + $0x68] sm:$0xff]   ;;  %v3757_v15 = vld [vmem:[%s3973_s16 + $0x70] sm:$0xff]  }
  0x18   : > { %v3758_v16 = vld [vmem:[%s3973_s16 + $0x78] sm:$0xff]   ;;  %v4018_v17 = vld [vmem:[%s4015_s21 + $0x4] ss:$8 sps:$4 sm:$0xff]  }
  0x19   : > { %1150 = vmatprep.mubr.bf16.mxu1 %v4018_v17 }
  0x1d   : > { %3520 = vmatmul.mubr.msk.bf16.gmra.mrb[4].mxu0 %vm700_vm0, %v3746_v4 }
  0x1e   : > { %3523 = vmatprep.mubr.msk.bf16.mxu0 %vm700_vm0, %v3747_v5 }
  0x25   : > { %3524 = vmatmul.mubr.msk.bf16.gmra.mrb[8].mxu0 %vm700_vm0, %v3748_v6 }
  0x26   : > { %3527 = vmatprep.mubr.msk.bf16.mxu0 %vm700_vm0, %v3749_v7 }
  0x2d   : > { %3528 = vmatmul.mubr.msk.bf16.gmra.mrb[12].mxu0 %vm700_vm0, %v3750_v8 }
  0x2e   : > { %3531 = vmatprep.mubr.msk.bf16.mxu0 %vm700_vm0, %v3751_v9 }
  0x35   : > { %3532 = vmatmul.mubr.msk.bf16.gmra.mrb[16].mxu0 %vm700_vm0, %v3752_v10 }
  0x36   : > { %3535 = vmatprep.mubr.msk.bf16.mxu0 %vm700_vm0, %v3753_v11 }
  0x3d   : > { %3536 = vmatmul.mubr.msk.bf16.gmra.mrb[20].mxu0 %vm700_vm0, %v3754_v12 }
  0x3e   : > { %3539 = vmatprep.mubr.msk.bf16.mxu0 %vm700_vm0, %v3755_v13 }
  0x45   : > { %3540 = vmatmul.mubr.msk.bf16.gmra.mrb[24].mxu0 %vm700_vm0, %v3756_v14 }
  0x46   : > { %3543 = vmatprep.mubr.msk.bf16.mxu0 %vm700_vm0, %v3757_v15 }
  0x4d   : > { %3544 = vmatmul.mubr.msk.bf16.gmra.mrb[28].mxu0 %vm700_vm0, %v3758_v16 }
  0xe8   : > { %v3517_v18 = vpop.f32.mrb[0].mxu0 }
  0xe9   : > { %v783_v19 = vpop.f32.mrb[1].mxu0  ;;  %v792_v50 = vadd.f32 %v3517_v18, %v4038_v34 }
  0xea   : > { %v3518_v20 = vpop.f32.mrb[2].mxu0  ;;  %v784_v40 = vadd.f32 %v4038_v34, %v783_v19 }
  0xeb   : > { %v786_v21 = vpop.f32.mrb[3].mxu0  ;;  %v795_v45 = vadd.f32 %v3518_v20, %v4038_v34  ;;  %v4070_v62 = vmax.f32 %v792_v50, 0.0 }
  0xec   : > { %v787_v36 = vadd.f32 %v4038_v34, %v786_v21  ;;  %v4056_v51 = vmax.f32 %v784_v40, 0.0 }
  0xed   : > { %v4062_v55 = vmax.f32 %v795_v45, 0.0 }
  0xee   : > { %v4047_v46 = vmax.f32 %v787_v36, 0.0 }
  0xef   : > { %v943_v6 = vpack.c.bf16 %v4062_v55, %v4070_v62 }
  0xf0   : > { %v3521_v22 = vpop.f32.mrb[4].mxu0  ;;  %v942_v58 = vpack.c.bf16 %v4047_v46, %v4056_v51 }
  0xf1   : > { %v799_v23 = vpop.f32.mrb[5].mxu0  ;;  %v808_v10 = vadd.f32 %v3521_v22, %v4038_v34 }
  0xf2   : > { %v3522_v24 = vpop.f32.mrb[6].mxu0  ;;  %v800_v63 = vadd.f32 %v4038_v34, %v799_v23 }
  0xf3   : > { %v802_v25 = vpop.f32.mrb[7].mxu0  ;;  %v811_v4 = vadd.f32 %v3522_v24, %v4038_v34  ;;  %v4102_v23 = vmax.f32 %v808_v10, 0.0 }
  0xf4   : > { %v803_v56 = vadd.f32 %v4038_v34, %v802_v25  ;;  %v4088_v11 = vmax.f32 %v800_v63, 0.0 }
  0xf5   : > { %v4094_v15 = vmax.f32 %v811_v4, 0.0 }
  0xf6   : > { %v4077_v5 = vmax.f32 %v803_v56, 0.0 }
  0xf8   : > { %v4021_v26 = vpop.f32.mrb[8].mxu0  ;;  %v944_v19 = vpack.c.bf16 %v4077_v5, %v4088_v11 }
  0xf9   : > { %v4023_v27 = vpop.f32.mrb[9].mxu0 }
  0xfa   : > { %v4025_v28 = vpop.f32.mrb[10].mxu0  ;;  %v816_v24 = vadd.f32 %v4038_v34, %v4023_v27 }
  0xfb   : > { %v818_v29 = vpop.f32.mrb[11].mxu0 }
  0xfc   : > { %v819_v16 = vadd.f32 %v4038_v34, %v818_v29 }
 0x100   : > { %v4027_v30 = vpop.f32.mrb[12].mxu0 }
 0x101   : > { %v4029_v31 = vpop.f32.mrb[13].mxu0  ;;  %v840_v10 = vadd.f32 %v4027_v30, %v4038_v34  ;;  %v4174_v30 = vld [vmem:[%s4693_s7] sm:$0xff]  }
 0x102   : > { %v4031_v32 = vpop.f32.mrb[14].mxu0  ;;  %3547 = vmatprep.subr.bf16.mxu0 %v4174_v30 }
 0x103   : > { %v4033_v33 = vpop.f32.mrb[15].mxu0  ;;  %3548 = vmatpush3.bf16.msra.mxu0 %v4174_v30 }
 0x108   : > { %v3533_v35 = vpop.f32.mrb[16].mxu0 }
 0x109   : > { %v847_v37 = vpop.f32.mrb[17].mxu0  ;;  %v856_v43 = vadd.f32 %v3533_v35, %v4038_v34 }
 0x10a   : > { %v848_v38 = vadd.f32 %v4038_v34, %v847_v37  ;;  %v3534_v39 = vpop.f32.mrb[18].mxu0  ;;  %v827_v37 = vadd.f32 %v4025_v28, %v4038_v34 }
 0x10b   : > { %v859_v41 = vadd.f32 %v3534_v39, %v4038_v34  ;;  %v850_v42 = vpop.f32.mrb[19].mxu0  ;;  %v4058_v52 = vmax.f32 %v856_v43, 0.0  ;;  %v945_v39 = vpack.c.bf16 %v4094_v15, %v4102_v23  ;;  %v4123_v43 = vmax.f32 %v816_v24, 0.0  ;;  %v4194_v24 = vld [vmem:[%s4693_s7 + $0x10] sm:$0xff]  }
 0x10c   : > { %v851_v44 = vadd.f32 %v4038_v34, %v850_v42  ;;  %v4049_v47 = vmax.f32 %v848_v38, 0.0  ;;  %v4111_v38 = vmax.f32 %v819_v16, 0.0  ;;  %v824_v42 = vadd.f32 %v4021_v26, %v4038_v34 }
 0x10d   : > { %v4051_v48 = vmax.f32 %v859_v41, 0.0  ;;  %v4129_v50 = vmax.f32 %v827_v37, 0.0  ;;  %v4227_v37 = vld [vmem:[%s4015_s21 + $0x20] ss:$8 sps:$4 sm:$0xff]  }
 0x10e   : > { %v4053_v49 = vmax.f32 %v851_v44, 0.0  ;;  %v946_v56 = vpack.c.bf16 %v4111_v38, %v4123_v43 }
 0x10f   : > { %4739 = vst [vmem:[#allocation2_spill] sm:$0xff] %v4051_v48  ;;  %v951_v61 = vpack.c.bf16 %v4051_v48, %v4058_v52  ;;  %4740 = vst [vmem:[#allocation3_spill] sm:$0xff] %v4129_v50 }
 0x110   : > { %v3537_v53 = vpop.f32.mrb[20].mxu0  ;;  %v950_v54 = vpack.c.bf16 %v4053_v49, %v4049_v47 }
 0x111   : > { %v863_v57 = vpop.f32.mrb[21].mxu0  ;;  %v872_v2 = vadd.f32 %v3537_v53, %v4038_v34  ;;  %v835_v53 = vadd.f32 %v4038_v34, %v4033_v33 }
 0x112   : > { %v864_v59 = vadd.f32 %v4038_v34, %v863_v57  ;;  %v3538_v60 = vpop.f32.mrb[22].mxu0  ;;  %3057 = vmatprep.subr.bf16.mxu1 %v950_v54 }
 0x113   : > { %v875_v0 = vadd.f32 %v3538_v60, %v4038_v34  ;;  %v866_v1 = vpop.f32.mrb[23].mxu0  ;;  %3058 = vmatpush3.bf16.msra.mxu1 %v942_v58  ;;  %v4090_v12 = vmax.f32 %v872_v2, 0.0  ;;  %v832_v60 = vadd.f32 %v4038_v34, %v4029_v31  ;;  %v4147_v2 = vmax.f32 %v835_v53, 0.0  ;;  %v4247_v53 = vld [vmem:[%s4015_s21 + $0x54] ss:$8 sps:$4 sm:$0xff]  }
 0x114   : > { %v867_v3 = vadd.f32 %v4038_v34, %v866_v1  ;;  %3059 = vmatprep.subr.bf16.mxu1 %v951_v61  ;;  %v4081_v7 = vmax.f32 %v864_v59, 0.0  ;;  %v4138_v59 = vmax.f32 %v824_v42, 0.0  ;;  %v843_v1 = vadd.f32 %v4031_v32, %v4038_v34  ;;  %v4236_v42 = vld [vmem:[%s4015_s21 + $0x30] ss:$8 sps:$4 sm:$0xff]   ;;  %4746 = vst [vmem:[#allocation9_spill] sm:$0xff] %v4247_v53 }
 0x115   : > { %v4083_v8 = vmax.f32 %v875_v0, 0.0  ;;  %4743 = vst [vmem:[#allocation6_spill] sm:$0xff] %v4236_v42 }
 0x116   : > { %v4085_v9 = vmax.f32 %v867_v3, 0.0  ;;  %v947_v3 = vpack.c.bf16 %v4129_v50, %v4138_v59  ;;  %v4165_v16 = vmax.f32 %v843_v1, 0.0  ;;  %v4292_v1 = vld [vmem:[%s4015_s21 + $0xa0] ss:$8 sps:$4 sm:$0xff]  }
 0x117   : > { %3060 = vmatpush3.bf16.msra.mxu1 %v943_v6  ;;  %v953_v22 = vpack.c.bf16 %v4083_v8, %v4090_v12  ;;  %4757 = vst [vmem:[#allocation20_spill] sm:$0xff] %v4292_v1 }
 0x118   : > { %v3541_v13 = vpop.f32.mrb[24].mxu0  ;;  %v952_v14 = vpack.c.bf16 %v4085_v9, %v4081_v7  ;;  %4742 = vst [vmem:[#allocation5_spill] sm:$0xff] %v4165_v16 }
 0x119   : > { %v879_v18 = vpop.f32.mrb[25].mxu0  ;;  %v888_v29 = vadd.f32 %v3541_v13, %v4038_v34  ;;  %v4159_v13 = vmax.f32 %v832_v60, 0.0  ;;  %v4271_v60 = vld [vmem:[%s4015_s21 + $0x84] ss:$8 sps:$4 sm:$0xff]  }
 0x11a   : > { %v880_v20 = vadd.f32 %v4038_v34, %v879_v18  ;;  %v3542_v21 = vpop.f32.mrb[26].mxu0  ;;  %3061 = vmatprep.subr.bf16.mxu1 %v952_v14  ;;  %4752 = vst [vmem:[#allocation15_spill] sm:$0xff] %v4271_v60 }
 0x11b   : > { %v891_v25 = vadd.f32 %v3542_v21, %v4038_v34  ;;  %v882_v35 = vpop.f32.mrb[27].mxu0  ;;  %3062 = vmatpush3.bf16.msra.mxu1 %v944_v19  ;;  %v4125_v44 = vmax.f32 %v888_v29, 0.0  ;;  %4741 = vst [vmem:[#allocation4_spill] sm:$0xff] %v4159_v13  ;;  %v948_v18 = vpack.c.bf16 %v4147_v2, %v4159_v13  ;;  %v4213_v29 = vld [vmem:[%s4015_s21 + $0x10] ss:$8 sps:$4 sm:$0xff]  }
 0x11c   : > { %v883_v36 = vadd.f32 %v4038_v34, %v882_v35  ;;  %3063 = vmatprep.subr.bf16.mxu1 %v953_v22  ;;  %v4115_v40 = vmax.f32 %v880_v20, 0.0  ;;  %v4181_v20 = vmax.f32 %v840_v10, 0.0  ;;  %v4188_v22 = vld [vmem:[%s4015_s21] ss:$8 sps:$4 sm:$0xff]   ;;  %v4206_v35 = vld [vmem:[%s4693_s7 + $0x18] sm:$0xff]  }
 0x11d   : > { %v4117_v27 = vmax.f32 %v891_v25, 0.0  ;;  %v4197_v25 = vld [vmem:[%s4015_s21 + $0x14] ss:$8 sps:$4 sm:$0xff]   ;;  %v4302_v10 = vld [vmem:[%s4693_s7 + $0x20] sm:$0xff]  }
 0x11e   : > { %v4119_v41 = vmax.f32 %v883_v36, 0.0  ;;  %v949_v21 = vpack.c.bf16 %v4165_v16, %v4181_v20  ;;  %v4217_v36 = vld [vmem:[%s4015_s21 + $0x24] ss:$8 sps:$4 sm:$0xff]  }
 0x11f   : > { %3064 = vmatpush3.bf16.msra.mxu1 %v945_v39  ;;  %v955_v58 = vpack.c.bf16 %v4117_v27, %v4125_v44  ;;  %v4230_v39 = vld [vmem:[%s4015_s21 + $0x34] ss:$8 sps:$4 sm:$0xff]  }
 0x120   : > { %v3545_v28 = vpop.f32.mrb[28].mxu0  ;;  %v954_v45 = vpack.c.bf16 %v4119_v41, %v4115_v40 }
 0x121   : > { %v895_v54 = vpop.f32.mrb[29].mxu0  ;;  %v904_v33 = vadd.f32 %v3545_v28, %v4038_v34  ;;  %v4239_v28 = vld [vmem:[%s4015_s21 + $0x44] ss:$8 sps:$4 sm:$0xff]  }
 0x122   : > { %v896_v26 = vadd.f32 %v4038_v34, %v895_v54  ;;  %v3546_v57 = vpop.f32.mrb[30].mxu0  ;;  %3065 = vmatprep.subr.bf16.mxu1 %v954_v45  ;;  %4744 = vst [vmem:[#allocation7_spill] sm:$0xff] %v4239_v28  ;;  %v4244_v45 = vld [vmem:[%s4015_s21 + $0x40] ss:$8 sps:$4 sm:$0xff]   ;;  %v4252_v54 = vld [vmem:[%s4015_s21 + $0x50] ss:$8 sps:$4 sm:$0xff]  }
 0x123   : > { %v907_v61 = vadd.f32 %v3546_v57, %v4038_v34  ;;  %v898_v63 = vpop.f32.mrb[31].mxu0  ;;  %3066 = vmatpush3.bf16.msra.mxu1 %v946_v56  ;;  %v4161_v14 = vmax.f32 %v904_v33, 0.0  ;;  %4745 = vst [vmem:[#allocation8_spill] sm:$0xff] %v4244_v45  ;;  %4747 = vst [vmem:[#allocation10_spill] sm:$0xff] %v4252_v54  ;;  %v4255_v56 = vld [vmem:[%s4015_s21 + $0x64] ss:$8 sps:$4 sm:$0xff]  }
 0x124   : > { %v899_v0 = vadd.f32 %v4038_v34, %v898_v63  ;;  %3067 = vmatprep.subr.bf16.mxu1 %v955_v58  ;;  %v4151_v4 = vmax.f32 %v896_v26, 0.0  ;;  %v4179_v34 = vld [vmem:[%s4693_s7 + $0x8] sm:$0xff]   ;;  %4748 = vst [vmem:[#allocation11_spill] sm:$0xff] %v4255_v56  ;;  %v4263_v57 = vld [vmem:[%s4015_s21 + $0x74] ss:$8 sps:$4 sm:$0xff]  }
 0x125   : > { %v4153_v31 = vmax.f32 %v907_v61, 0.0  ;;  %3549 = vmatprep.subr.bf16.mxu0 %v4179_v34  ;;  %v4260_v26 = vld [vmem:[%s4015_s21 + $0x60] ss:$8 sps:$4 sm:$0xff]   ;;  %4750 = vst [vmem:[#allocation13_spill] sm:$0xff] %v4263_v57  ;;  %v4268_v58 = vld [vmem:[%s4015_s21 + $0x70] ss:$8 sps:$4 sm:$0xff]  }
 0x126   : > { %v4155_v6 = vmax.f32 %v899_v0, 0.0  ;;  %3550 = vmatpush3.bf16.msra.mxu0 %v4179_v34  ;;  %4749 = vst [vmem:[#allocation12_spill] sm:$0xff] %v4260_v26  ;;  %4751 = vst [vmem:[#allocation14_spill] sm:$0xff] %v4268_v58  ;;  %v4276_v61 = vld [vmem:[%s4015_s21 + $0x80] ss:$8 sps:$4 sm:$0xff]  }
 0x127   : > { %3068 = vmatpush3.bf16.msra.mxu1 %v947_v3  ;;  %v957_v19 = vpack.c.bf16 %v4153_v31, %v4161_v14  ;;  %3551 = vmatprep.subr.bf16.mxu0 %v4194_v24  ;;  %4753 = vst [vmem:[#allocation16_spill] sm:$0xff] %v4276_v61  ;;  %v4279_v63 = vld [vmem:[%s4015_s21 + $0x94] ss:$8 sps:$4 sm:$0xff]   ;;  %v4284_v33 = vld [vmem:[%s4015_s21 + $0x90] ss:$8 sps:$4 sm:$0xff]  }
 0x128   : > { %v956_v32 = vpack.c.bf16 %v4155_v6, %v4151_v4  ;;  %4754 = vst [vmem:[#allocation17_spill] sm:$0xff] %v4279_v63  ;;  %4755 = vst [vmem:[#allocation18_spill] sm:$0xff] %v4284_v33  ;;  %v4287_v0 = vld [vmem:[%s4015_s21 + $0xa4] ss:$8 sps:$4 sm:$0xff]   ;;  %v4295_v3 = vld [vmem:[%s4015_s21 + $0xb4] ss:$8 sps:$4 sm:$0xff]  }
 0x129   : > { %4756 = vst [vmem:[#allocation19_spill] sm:$0xff] %v4287_v0  ;;  %4758 = vst [vmem:[#allocation21_spill] sm:$0xff] %v4295_v3 }
 0x12a   : > { %3069 = vmatprep.subr.bf16.mxu1 %v956_v32  ;;  %3552 = vmatpush3.bf16.msra.mxu0 %v4194_v24  ;;  %v4307_v32 = vld [vmem:[%s4015_s21 + $0xb0] ss:$8 sps:$4 sm:$0xff]  }
 0x12b   : > { %3070 = vmatpush3.bf16.msra.mxu1 %v948_v18  ;;  %3553 = vmatprep.subr.bf16.mxu0 %v4206_v35  ;;  %4759 = vst [vmem:[#allocation22_spill] sm:$0xff] %v4307_v32  ;;  %v4312_v18 = vld [vmem:[%s4015_s21 + $0xc4] ss:$8 sps:$4 sm:$0xff]  }
 0x12c   : > { %3071 = vmatprep.subr.bf16.mxu1 %v957_v19  ;;  %4760 = vst [vmem:[#allocation23_spill] sm:$0xff] %v4312_v18  ;;  %v4317_v19 = vld [vmem:[%s4693_s7 + $0x28] sm:$0xff]  }
 0x12d   : > { %4761 = vst [vmem:[#allocation24_spill] sm:$0xff] %v4317_v19 }
 0x12e   : > { %3554 = vmatpush3.bf16.msra.mxu0 %v4206_v35 }
 0x12f   : > { %3072 = vmatpush3.bf16.msra.mxu1 %v949_v21  ;;  %3555 = vmatprep.subr.bf16.mxu0 %v4302_v10  ;;  %v4327_v21 = vld [vmem:[%s4693_s7 + $0x30] sm:$0xff]  }
 0x130   : > { %3595 = vmatprep.subr.bf16.mxu1 %v4174_v30  ;;  %4762 = vst [vmem:[#allocation25_spill] sm:$0xff] %v4327_v21 }
 0x132   : > { %1151 = vmatmul.mubr.bf16.vlgmr.msra.gmra.mrb[0].mxu1 %v4188_v22  ;;  %3556 = vmatpush3.bf16.msra.mxu0 %v4302_v10 }
 0x133   : > { %1158 = vmatprep.mubr.bf16.mxu1 %v4197_v25  ;;  %3596 = vmatpush3.bf16.msra.mxu1 %v4174_v30 }
 0x134   : > { %3597 = vmatprep.subr.bf16.mxu1 %v4179_v34  ;;  %3557 = vmatprep.subr.bf16.mxu0 %v4317_v19 }
 0x136   : > { %3558 = vmatpush3.bf16.msra.mxu0 %v4317_v19 }
 0x137   : > { %3598 = vmatpush3.bf16.msra.mxu1 %v4179_v34  ;;  %3559 = vmatprep.subr.bf16.mxu0 %v4327_v21 }
 0x138   : > { %3599 = vmatprep.subr.bf16.mxu1 %v4194_v24 }
 0x13a   : > { %1159 = vmatmul.mubr.bf16.gmra.mrb[4].mxu1 %v4213_v29  ;;  %3560 = vmatpush3.bf16.msra.mxu0 %v4327_v21 }
 0x13b   : > { %1166 = vmatprep.mubr.bf16.mxu1 %v4217_v36  ;;  %3600 = vmatpush3.bf16.msra.mxu1 %v4194_v24 }
 0x13c   : > { %3601 = vmatprep.subr.bf16.mxu1 %v4206_v35 }
 0x13f   : > { %3602 = vmatpush3.bf16.msra.mxu1 %v4206_v35 }
 0x140   : > { %3603 = vmatprep.subr.bf16.mxu1 %v4302_v10 }
 0x142   : > { %1167 = vmatmul.mubr.bf16.gmra.mrb[8].mxu1 %v4227_v37 }
 0x143   : > { %1174 = vmatprep.mubr.bf16.mxu1 %v4230_v39  ;;  %3604 = vmatpush3.bf16.msra.mxu1 %v4302_v10 }
 0x144   : > { %3605 = vmatprep.subr.bf16.mxu1 %v4317_v19 }
 0x147   : > { %3606 = vmatpush3.bf16.msra.mxu1 %v4317_v19 }
 0x148   : > { %3607 = vmatprep.subr.bf16.mxu1 %v4327_v21 }
 0x14a   : > { %1175 = vmatmul.mubr.bf16.gmra.mrb[12].mxu1 %v4236_v42 }
 0x14b   : > { %1182 = vmatprep.mubr.bf16.mxu1 %v4239_v28  ;;  %3608 = vmatpush3.bf16.msra.mxu1 %v4327_v21 }
 0x152   : > { %1183 = vmatmul.mubr.bf16.gmra.mrb[16].mxu1 %v4244_v45 }
 0x153   : > { %1190 = vmatprep.mubr.bf16.mxu1 %v4247_v53 }
 0x15a   : > { %1191 = vmatmul.mubr.bf16.gmra.mrb[20].mxu1 %v4252_v54 }
 0x15b   : > { %1198 = vmatprep.mubr.bf16.mxu1 %v4255_v56 }
 0x162   : > { %1199 = vmatmul.mubr.bf16.gmra.mrb[24].mxu1 %v4260_v26 }
 0x163   : > { %1206 = vmatprep.mubr.bf16.mxu1 %v4263_v57 }
 0x16a   : > { %1207 = vmatmul.mubr.bf16.gmra.mrb[28].mxu1 %v4268_v58 }
 0x16b   : > { %1214 = vmatprep.mubr.bf16.mxu1 %v4271_v60 }
 0x172   : > { %1215 = vmatmul.mubr.bf16.gmra.mrb[32].mxu1 %v4276_v61 }
 0x173   : > { %1222 = vmatprep.mubr.bf16.mxu1 %v4279_v63  ;;  %v4363_v63 = vld [vmem:[%s4015_s21 + $0xf4] ss:$8 sps:$4 sm:$0xff]  }
 0x174   : > { %4769 = vst [vmem:[#allocation32_spill] sm:$0xff] %v4363_v63 }
 0x17a   : > { %1223 = vmatmul.mubr.bf16.gmra.mrb[36].mxu1 %v4284_v33  ;;  %v4360_v33 = vld [vmem:[%s4015_s21 + $0xe0] ss:$8 sps:$4 sm:$0xff]  }
 0x17b   : > { %1230 = vmatprep.mubr.bf16.mxu1 %v4287_v0  ;;  %v4355_v0 = vld [vmem:[%s4015_s21 + $0xe4] ss:$8 sps:$4 sm:$0xff]   ;;  %4768 = vst [vmem:[#allocation31_spill] sm:$0xff] %v4360_v33 }
 0x17c   : > { %4767 = vst [vmem:[#allocation30_spill] sm:$0xff] %v4355_v0 }
 0x182   : > { %1231 = vmatmul.mubr.bf16.gmra.mrb[40].mxu1 %v4292_v1  ;;  %v4352_v1 = vld [vmem:[%s4015_s21 + $0xd0] ss:$8 sps:$4 sm:$0xff]  }
 0x183   : > { %1238 = vmatprep.mubr.bf16.mxu1 %v4295_v3  ;;  %v4333_v3 = vld [vmem:[%s4015_s21 + $0xc0] ss:$8 sps:$4 sm:$0xff]   ;;  %4766 = vst [vmem:[#allocation29_spill] sm:$0xff] %v4352_v1 }
 0x184   : > { %4763 = vst [vmem:[#allocation26_spill] sm:$0xff] %v4333_v3 }
 0x18a   : > { %1239 = vmatmul.mubr.bf16.gmra.mrb[44].mxu1 %v4307_v32  ;;  %v4342_v32 = vld [vmem:[%s4693_s7 + $0x38] sm:$0xff]  }
 0x18b   : > { %1246 = vmatprep.mubr.bf16.mxu1 %v4312_v18  ;;  %v4337_v18 = vld [vmem:[%s4015_s21 + $0xd4] ss:$8 sps:$4 sm:$0xff]   ;;  %4765 = vst [vmem:[#allocation28_spill] sm:$0xff] %v4342_v32  ;;  %3561 = vmatprep.subr.bf16.mxu0 %v4342_v32 }
 0x18c   : > { %4764 = vst [vmem:[#allocation27_spill] sm:$0xff] %v4337_v18  ;;  %3609 = vmatprep.subr.bf16.mxu1 %v4342_v32  ;;  %3562 = vmatpush3.bf16.msra.mxu0 %v4342_v32 }
 0x18d   : > { %3610 = vmatpush3.bf16.msra.mxu1 %v4342_v32 }
 0x192   : > { %1247 = vmatmul.mubr.bf16.gmra.mrb[48].mxu1 %v4333_v3  ;;  %v4368_v3 = vld [vmem:[%s4015_s21 + $0xf0] ss:$8 sps:$4 sm:$0xff]  }
 0x193   : > { %1254 = vmatprep.mubr.bf16.mxu1 %v4337_v18  ;;  %4770 = vst [vmem:[#allocation33_spill] sm:$0xff] %v4368_v3 }
 0x19a   : > { %1255 = vmatmul.mubr.bf16.gmra.mrb[52].mxu1 %v4352_v1 }
 0x19b   : > { %1262 = vmatprep.mubr.bf16.mxu1 %v4355_v0 }
 0x1a2   : > { %1263 = vmatmul.mubr.bf16.gmra.mrb[56].mxu1 %v4360_v33 }
 0x1a3   : > { %1270 = vmatprep.mubr.bf16.mxu1 %v4363_v63 }
 0x1aa   : > { %1271 = vmatmul.mubr.bf16.gmra.mrb[60].mxu1 %v4368_v3 }
 0x205   : > { %v3073_v18 = vpop.f32.mrb[0].mxu1 }
 0x206   : > { %v3074_v61 = vpop.f32.mrb[1].mxu1 }
 0x207   : > { %v3075_v60 = vadd.f32 %v3074_v61, %v3073_v18  ;;  %v3076_v58 = vpop.f32.mrb[2].mxu1 }
 0x208   : > { %v3077_v57 = vpop.f32.mrb[3].mxu1 }
 0x209   : > { %v3078_v1 = vadd.f32 %v3077_v57, %v3076_v58 }
 0x20b   : > { %v1279_v26 = vpack.c.bf16 %v3078_v1, %v3075_v60 }
 0x20d   : > { %v3079_v0 = vpop.f32.mrb[4].mxu1  ;;  %3563 = vmatprep.mubr.bf16.mxu0 %v1279_v26 }
 0x20e   : > { %v3080_v56 = vpop.f32.mrb[5].mxu1 }
 0x20f   : > { %v3081_v54 = vadd.f32 %v3080_v56, %v3079_v0  ;;  %v3082_v53 = vpop.f32.mrb[6].mxu1 }
 0x210   : > { %v3083_v45 = vpop.f32.mrb[7].mxu1 }
 0x211   : > { %v3084_v33 = vadd.f32 %v3083_v45, %v3082_v53 }
 0x213   : > { %v1280_v32 = vpack.c.bf16 %v3084_v33, %v3081_v54 }
 0x215   : > { %v3085_v63 = vpop.f32.mrb[8].mxu1  ;;  %3564 = vmatmul.mubr.bf16.vlgmr.msra.gmra.mrb[32].mxu0 %v1280_v32 }
 0x216   : > { %v3086_v28 = vpop.f32.mrb[9].mxu1 }
 0x217   : > { %v3087_v42 = vadd.f32 %v3086_v28, %v3085_v63  ;;  %v3088_v3 = vpop.f32.mrb[10].mxu1 }
 0x218   : > { %v3089_v21 = vpop.f32.mrb[11].mxu1 }
 0x219   : > { %v3090_v19 = vadd.f32 %v3089_v21, %v3088_v3 }
 0x21b   : > { %v1281_v61 = vpack.c.bf16 %v3090_v19, %v3087_v42 }
 0x21d   : > { %v3091_v18 = vpop.f32.mrb[12].mxu1  ;;  %3567 = vmatprep.mubr.bf16.mxu0 %v1281_v61 }
 0x21e   : > { %v3092_v57 = vpop.f32.mrb[13].mxu1 }
 0x21f   : > { %v3093_v58 = vadd.f32 %v3092_v57, %v3091_v18  ;;  %v3094_v60 = vpop.f32.mrb[14].mxu1 }
 0x220   : > { %v3095_v26 = vpop.f32.mrb[15].mxu1 }
 0x221   : > { %v3096_v1 = vadd.f32 %v3095_v26, %v3094_v60 }
 0x223   : > { %v1282_v56 = vpack.c.bf16 %v3096_v1, %v3093_v58 }
 0x225   : > { %v3097_v0 = vpop.f32.mrb[16].mxu1  ;;  %3568 = vmatmul.mubr.bf16.gmra.mrb[36].mxu0 %v1282_v56 }
 0x226   : > { %v3098_v45 = vpop.f32.mrb[17].mxu1 }
 0x227   : > { %v3099_v53 = vadd.f32 %v3098_v45, %v3097_v0  ;;  %v3100_v54 = vpop.f32.mrb[18].mxu1 }
 0x228   : > { %v3101_v33 = vpop.f32.mrb[19].mxu1 }
 0x229   : > { %v3102_v32 = vadd.f32 %v3101_v33, %v3100_v54 }
 0x22b   : > { %v1283_v28 = vpack.c.bf16 %v3102_v32, %v3099_v53 }
 0x22d   : > { %v3103_v63 = vpop.f32.mrb[20].mxu1  ;;  %3571 = vmatprep.mubr.bf16.mxu0 %v1283_v28 }
 0x22e   : > { %v3104_v3 = vpop.f32.mrb[21].mxu1 }
 0x22f   : > { %v3105_v42 = vadd.f32 %v3104_v3, %v3103_v63  ;;  %v3106_v19 = vpop.f32.mrb[22].mxu1 }
 0x230   : > { %v3107_v21 = vpop.f32.mrb[23].mxu1 }
 0x231   : > { %v3108_v61 = vadd.f32 %v3107_v21, %v3106_v19 }
 0x233   : > { %v1284_v18 = vpack.c.bf16 %v3108_v61, %v3105_v42 }
 0x235   : > { %v3109_v57 = vpop.f32.mrb[24].mxu1  ;;  %3572 = vmatmul.mubr.bf16.gmra.mrb[40].mxu0 %v1284_v18 }
 0x236   : > { %v3110_v60 = vpop.f32.mrb[25].mxu1 }
 0x237   : > { %v3111_v58 = vadd.f32 %v3110_v60, %v3109_v57  ;;  %v3112_v26 = vpop.f32.mrb[26].mxu1 }
 0x238   : > { %v3113_v1 = vpop.f32.mrb[27].mxu1 }
 0x239   : > { %v3114_v56 = vadd.f32 %v3113_v1, %v3112_v26 }
 0x23b   : > { %v1285_v0 = vpack.c.bf16 %v3114_v56, %v3111_v58 }
 0x23d   : > { %v3115_v45 = vpop.f32.mrb[28].mxu1  ;;  %3575 = vmatprep.mubr.bf16.mxu0 %v1285_v0 }
 0x23e   : > { %v3116_v54 = vpop.f32.mrb[29].mxu1 }
 0x23f   : > { %v3117_v53 = vadd.f32 %v3116_v54, %v3115_v45  ;;  %v3118_v33 = vpop.f32.mrb[30].mxu1 }
 0x240   : > { %v3119_v32 = vpop.f32.mrb[31].mxu1 }
 0x241   : > { %v3120_v28 = vadd.f32 %v3119_v32, %v3118_v33 }
 0x243   : > { %v1286_v63 = vpack.c.bf16 %v3120_v28, %v3117_v53 }
 0x245   : > { %v3121_v3 = vpop.f32.mrb[32].mxu1  ;;  %3576 = vmatmul.mubr.bf16.gmra.mrb[44].mxu0 %v1286_v63 }
 0x246   : > { %v3122_v19 = vpop.f32.mrb[33].mxu1 }
 0x247   : > { %v3123_v42 = vadd.f32 %v3122_v19, %v3121_v3  ;;  %v3124_v21 = vpop.f32.mrb[34].mxu1 }
 0x248   : > { %v3125_v61 = vpop.f32.mrb[35].mxu1 }
 0x249   : > { %v3126_v18 = vadd.f32 %v3125_v61, %v3124_v21 }
 0x24b   : > { %v1287_v57 = vpack.c.bf16 %v3126_v18, %v3123_v42 }
 0x24d   : > { %v3127_v60 = vpop.f32.mrb[36].mxu1  ;;  %3579 = vmatprep.mubr.bf16.mxu0 %v1287_v57 }
 0x24e   : > { %v3128_v26 = vpop.f32.mrb[37].mxu1 }
 0x24f   : > { %v3129_v58 = vadd.f32 %v3128_v26, %v3127_v60  ;;  %v3130_v1 = vpop.f32.mrb[38].mxu1 }
 0x250   : > { %v3131_v56 = vpop.f32.mrb[39].mxu1 }
 0x251   : > { %v3132_v0 = vadd.f32 %v3131_v56, %v3130_v1 }
 0x253   : > { %v1288_v45 = vpack.c.bf16 %v3132_v0, %v3129_v58 }
 0x255   : > { %v3133_v54 = vpop.f32.mrb[40].mxu1  ;;  %3580 = vmatmul.mubr.bf16.gmra.mrb[48].mxu0 %v1288_v45 }
 0x256   : > { %v3134_v33 = vpop.f32.mrb[41].mxu1 }
 0x257   : > { %v3135_v53 = vadd.f32 %v3134_v33, %v3133_v54  ;;  %v3136_v32 = vpop.f32.mrb[42].mxu1 }
 0x258   : > { %v3137_v28 = vpop.f32.mrb[43].mxu1 }
 0x259   : > { %v3138_v63 = vadd.f32 %v3137_v28, %v3136_v32 }
 0x25b   : > { %v1289_v3 = vpack.c.bf16 %v3138_v63, %v3135_v53 }
 0x25d   : > { %v3139_v19 = vpop.f32.mrb[44].mxu1  ;;  %3583 = vmatprep.mubr.bf16.mxu0 %v1289_v3 }
 0x25e   : > { %v3140_v21 = vpop.f32.mrb[45].mxu1 }
 0x25f   : > { %v3141_v42 = vadd.f32 %v3140_v21, %v3139_v19  ;;  %v3142_v61 = vpop.f32.mrb[46].mxu1 }
 0x260   : > { %v3143_v18 = vpop.f32.mrb[47].mxu1 }
 0x261   : > { %v3144_v57 = vadd.f32 %v3143_v18, %v3142_v61 }
 0x263   : > { %v1290_v60 = vpack.c.bf16 %v3144_v57, %v3141_v42 }
 0x265   : > { %v3145_v26 = vpop.f32.mrb[48].mxu1  ;;  %3584 = vmatmul.mubr.bf16.gmra.mrb[52].mxu0 %v1290_v60 }
 0x266   : > { %v3146_v1 = vpop.f32.mrb[49].mxu1 }
 0x267   : > { %v3147_v58 = vadd.f32 %v3146_v1, %v3145_v26  ;;  %v3148_v56 = vpop.f32.mrb[50].mxu1 }
 0x268   : > { %v3149_v0 = vpop.f32.mrb[51].mxu1 }
 0x269   : > { %v3150_v45 = vadd.f32 %v3149_v0, %v3148_v56 }
 0x26b   : > { %v1291_v54 = vpack.c.bf16 %v3150_v45, %v3147_v58 }
 0x26d   : > { %v3151_v33 = vpop.f32.mrb[52].mxu1  ;;  %3587 = vmatprep.mubr.bf16.mxu0 %v1291_v54 }
 0x26e   : > { %v3152_v32 = vpop.f32.mrb[53].mxu1 }
 0x26f   : > { %v3153_v53 = vadd.f32 %v3152_v32, %v3151_v33  ;;  %v3154_v28 = vpop.f32.mrb[54].mxu1 }
 0x270   : > { %v3155_v63 = vpop.f32.mrb[55].mxu1 }
 0x271   : > { %v3156_v3 = vadd.f32 %v3155_v63, %v3154_v28 }
 0x273   : > { %v1292_v19 = vpack.c.bf16 %v3156_v3, %v3153_v53 }
 0x275   : > { %v3157_v21 = vpop.f32.mrb[56].mxu1  ;;  %3588 = vmatmul.mubr.bf16.gmra.mrb[56].mxu0 %v1292_v19 }
 0x276   : > { %v3158_v61 = vpop.f32.mrb[57].mxu1 }
 0x277   : > { %v3159_v42 = vadd.f32 %v3158_v61, %v3157_v21  ;;  %v3160_v18 = vpop.f32.mrb[58].mxu1 }
 0x278   : > { %v3161_v57 = vpop.f32.mrb[59].mxu1 }
 0x279   : > { %v3162_v60 = vadd.f32 %v3161_v57, %v3160_v18 }
 0x27b   : > { %v1293_v26 = vpack.c.bf16 %v3162_v60, %v3159_v42 }
 0x27d   : > { %v3163_v1 = vpop.f32.mrb[60].mxu1  ;;  %3591 = vmatprep.mubr.bf16.mxu0 %v1293_v26 }
 0x27e   : > { %v3164_v56 = vpop.f32.mrb[61].mxu1 }
 0x27f   : > { %v3165_v58 = vadd.f32 %v3164_v56, %v3163_v1  ;;  %v3166_v0 = vpop.f32.mrb[62].mxu1 }
 0x280   : > { %v3167_v45 = vpop.f32.mrb[63].mxu1 }
 0x281   : > { %v3168_v54 = vadd.f32 %v3167_v45, %v3166_v0 }
 0x283   : > { %v1294_v33 = vpack.c.bf16 %v3168_v54, %v3165_v58 }
 0x285   : > { %3592 = vmatmul.mubr.bf16.gmra.mrb[60].mxu0 %v1294_v33 }
 0x286   : > { %1616 = vmatprep.mubr.bf16.mxu0 %v4018_v17 }
 0x2e8   : > { %v3565_v32 = vpop.f32.mrb[32].mxu0 }
 0x2e9   : > { %v1506_v53 = vadd.f32 %v3565_v32, %v4070_v62  ;;  %v1377_v28 = vpop.f32.mrb[33].mxu0 }
 0x2ea   : > { %v1504_v63 = vadd.f32 %v1377_v28, %v4056_v51  ;;  %v3566_v3 = vpop.f32.mrb[34].mxu0 }
 0x2eb   : > { %v1507_v19 = vadd.f32 %v3566_v3, %v4062_v55  ;;  %v1380_v21 = vpop.f32.mrb[35].mxu0  ;;  %v1538_v42 = vmax.f32 %v1506_v53, 0.0 }
 0x2ec   : > { %v1505_v61 = vadd.f32 %v1380_v21, %v4047_v46  ;;  %v1536_v57 = vmax.f32 %v1504_v63, 0.0 }
 0x2ed   : > { %v1539_v18 = vmax.f32 %v1507_v19, 0.0 }
 0x2ee   : > { %v1537_v60 = vmax.f32 %v1505_v61, 0.0 }
 0x2ef   : > { %v1569_v26 = vpack.c.bf16 %v1539_v18, %v1538_v42 }
 0x2f0   : > { %v1568_v1 = vpack.c.bf16 %v1537_v60, %v1536_v57 }
 0x2f8   : > { %v3569_v56 = vpop.f32.mrb[36].mxu0 }
 0x2f9   : > { %v1510_v17 = vadd.f32 %v3569_v56, %v4102_v23  ;;  %v1393_v58 = vpop.f32.mrb[37].mxu0 }
 0x2fa   : > { %v1508_v0 = vadd.f32 %v1393_v58, %v4088_v11  ;;  %v3570_v45 = vpop.f32.mrb[38].mxu0 }
 0x2fb   : > { %v1511_v54 = vadd.f32 %v3570_v45, %v4094_v15  ;;  %v1396_v33 = vpop.f32.mrb[39].mxu0  ;;  %v1542_v28 = vmax.f32 %v1510_v17, 0.0 }
 0x2fc   : > { %v1509_v32 = vadd.f32 %v1396_v33, %v4077_v5  ;;  %v1540_v53 = vmax.f32 %v1508_v0, 0.0 }
 0x2fd   : > { %v1543_v3 = vmax.f32 %v1511_v54, 0.0 }
 0x2fe   : > { %v1541_v19 = vmax.f32 %v1509_v32, 0.0 }
 0x2ff   : > { %v4380_v63 = vpack.c.bf16 %v1543_v3, %v1542_v28 }
 0x300   : > { %v1570_v21 = vpack.c.bf16 %v1541_v19, %v1540_v53 }
 0x308   : > { %v3573_v61 = vpop.f32.mrb[40].mxu0 }
 0x309   : > { %v1514_v42 = vadd.f32 %v3573_v61, %v4138_v59  ;;  %v1409_v18 = vpop.f32.mrb[41].mxu0 }
 0x30a   : > { %v1512_v57 = vadd.f32 %v1409_v18, %v4123_v43  ;;  %v3574_v60 = vpop.f32.mrb[42].mxu0 }
 0x30b   : > { %v1515_v56 = vadd.f32 %v3574_v60, %v4129_v50  ;;  %v1412_v58 = vpop.f32.mrb[43].mxu0  ;;  %v1546_v33 = vmax.f32 %v1514_v42, 0.0 }
 0x30c   : > { %v1513_v45 = vadd.f32 %v1412_v58, %v4111_v38  ;;  %v1544_v54 = vmax.f32 %v1512_v57, 0.0 }
 0x30d   : > { %v1547_v17 = vmax.f32 %v1515_v56, 0.0 }
 0x30e   : > { %v1545_v0 = vmax.f32 %v1513_v45, 0.0 }
 0x30f   : > { %v4386_v32 = vpack.c.bf16 %v1547_v17, %v1546_v33 }
 0x310   : > { %v4388_v28 = vpack.c.bf16 %v1545_v0, %v1544_v54 }
 0x318   : > { %v3577_v3 = vpop.f32.mrb[44].mxu0 }
 0x319   : > { %v1518_v53 = vadd.f32 %v3577_v3, %v4181_v20  ;;  %v1425_v19 = vpop.f32.mrb[45].mxu0 }
 0x31a   : > { %v1516_v61 = vadd.f32 %v1425_v19, %v4159_v13  ;;  %v3578_v18 = vpop.f32.mrb[46].mxu0 }
 0x31b   : > { %v1519_v60 = vadd.f32 %v3578_v18, %v4165_v16  ;;  %v1428_v50 = vpop.f32.mrb[47].mxu0  ;;  %v1550_v42 = vmax.f32 %v1518_v53, 0.0 }
 0x31c   : > { %v1517_v58 = vadd.f32 %v1428_v50, %v4147_v2  ;;  %v1548_v57 = vmax.f32 %v1516_v61, 0.0 }
 0x31d   : > { %v1551_v56 = vmax.f32 %v1519_v60, 0.0 }
 0x31e   : > { %v1549_v45 = vmax.f32 %v1517_v58, 0.0 }
 0x31f   : > { %v4394_v33 = vpack.c.bf16 %v1551_v56, %v1550_v42 }
 0x320   : > { %v4396_v17 = vpack.c.bf16 %v1549_v45, %v1548_v57 }
 0x328   : > { %v3581_v54 = vpop.f32.mrb[48].mxu0 }
 0x329   : > { %v1522_v0 = vadd.f32 %v3581_v54, %v4058_v52  ;;  %v1441_v3 = vpop.f32.mrb[49].mxu0 }
 0x32a   : > { %v1520_v19 = vadd.f32 %v1441_v3, %v4049_v47  ;;  %v3582_v13 = vpop.f32.mrb[50].mxu0 }
 0x32b   : > { %v1523_v18 = vadd.f32 %v3582_v13, %v4051_v48  ;;  %v1444_v16 = vpop.f32.mrb[51].mxu0  ;;  %v1554_v53 = vmax.f32 %v1522_v0, 0.0 }
 0x32c   : > { %v1521_v50 = vadd.f32 %v1444_v16, %v4053_v49  ;;  %v1552_v61 = vmax.f32 %v1520_v19, 0.0 }
 0x32d   : > { %v1555_v60 = vmax.f32 %v1523_v18, 0.0 }
 0x32e   : > { %v1553_v58 = vmax.f32 %v1521_v50, 0.0 }
 0x32f   : > { %v1577_v42 = vpack.c.bf16 %v1555_v60, %v1554_v53 }
 0x330   : > { %v1576_v56 = vpack.c.bf16 %v1553_v58, %v1552_v61 }
 0x332   : > { %3193 = vmatprep.subr.bf16.mxu0 %v1576_v56 }
 0x333   : > { %3194 = vmatpush3.bf16.msra.mxu0 %v1568_v1 }
 0x334   : > { %3195 = vmatprep.subr.bf16.mxu0 %v1577_v42 }
 0x337   : > { %3196 = vmatpush3.bf16.msra.mxu0 %v1569_v26 }
 0x338   : > { %v3585_v57 = vpop.f32.mrb[52].mxu0 }
 0x339   : > { %v1526_v45 = vadd.f32 %v3585_v57, %v4090_v12  ;;  %v1457_v54 = vpop.f32.mrb[53].mxu0 }
 0x33a   : > { %v1524_v3 = vadd.f32 %v1457_v54, %v4081_v7  ;;  %v3586_v13 = vpop.f32.mrb[54].mxu0 }
 0x33b   : > { %v1527_v48 = vadd.f32 %v3586_v13, %v4083_v8  ;;  %v1460_v16 = vpop.f32.mrb[55].mxu0  ;;  %v1558_v19 = vmax.f32 %v1526_v45, 0.0 }
 0x33c   : > { %v1525_v0 = vadd.f32 %v1460_v16, %v4085_v9  ;;  %v1556_v50 = vmax.f32 %v1524_v3, 0.0 }
 0x33d   : > { %v1559_v18 = vmax.f32 %v1527_v48, 0.0 }
 0x33e   : > { %v1557_v53 = vmax.f32 %v1525_v0, 0.0 }
 0x33f   : > { %v1579_v60 = vpack.c.bf16 %v1559_v18, %v1558_v19 }
 0x340   : > { %v1578_v1 = vpack.c.bf16 %v1557_v53, %v1556_v50 }
 0x342   : > { %3197 = vmatprep.subr.bf16.mxu0 %v1578_v1 }
 0x343   : > { %3198 = vmatpush3.bf16.msra.mxu0 %v1570_v21 }
 0x344   : > { %3199 = vmatprep.subr.bf16.mxu0 %v1579_v60 }
 0x347   : > { %3200 = vmatpush3.bf16.msra.mxu0 %v4380_v63 }
 0x348   : > { %v3589_v26 = vpop.f32.mrb[56].mxu0 }
 0x349   : > { %v1530_v61 = vadd.f32 %v3589_v26, %v4125_v44  ;;  %v1473_v58 = vpop.f32.mrb[57].mxu0 }
 0x34a   : > { %v1528_v42 = vadd.f32 %v1473_v58, %v4115_v40  ;;  %v3590_v56 = vpop.f32.mrb[58].mxu0 }
 0x34b   : > { %v1531_v57 = vadd.f32 %v3590_v56, %v4117_v27  ;;  %v1476_v45 = vpop.f32.mrb[59].mxu0  ;;  %v1562_v54 = vmax.f32 %v1530_v61, 0.0 }
 0x34c   : > { %v1529_v48 = vadd.f32 %v1476_v45, %v4119_v41  ;;  %v1560_v13 = vmax.f32 %v1528_v42, 0.0  ;;  %v4785_v45 = vld [vmem:[#allocation17_spill] sm:$0xff] }
 0x34d   : > { %v1563_v3 = vmax.f32 %v1531_v57, 0.0 }
 0x34e   : > { %v1561_v16 = vmax.f32 %v1529_v48, 0.0  ;;  %v4786_v48 = vld [vmem:[#allocation18_spill] sm:$0xff] }
 0x34f   : > { %v1581_v21 = vpack.c.bf16 %v1563_v3, %v1562_v54  ;;  %v4787_v54 = vld [vmem:[#allocation19_spill] sm:$0xff]  ;;  %v4788_v3 = vld [vmem:[#allocation20_spill] sm:$0xff] }
 0x350   : > { %v1580_v0 = vpack.c.bf16 %v1561_v16, %v1560_v13  ;;  %v4789_v13 = vld [vmem:[#allocation21_spill] sm:$0xff]  ;;  %v4790_v16 = vld [vmem:[#allocation22_spill] sm:$0xff] }
 0x352   : > { %3201 = vmatprep.subr.bf16.mxu0 %v1580_v0  ;;  %v4792_v0 = vld [vmem:[#allocation26_spill] sm:$0xff] }
 0x353   : > { %3202 = vmatpush3.bf16.msra.mxu0 %v4388_v28 }
 0x354   : > { %3203 = vmatprep.subr.bf16.mxu0 %v1581_v21  ;;  %v4791_v21 = vld [vmem:[#allocation23_spill] sm:$0xff] }
 0x357   : > { %3204 = vmatpush3.bf16.msra.mxu0 %v4386_v32  ;;  %v4782_v32 = vld [vmem:[#allocation14_spill] sm:$0xff] }
 0x358   : > { %v3593_v63 = vpop.f32.mrb[60].mxu0 }
 0x359   : > { %v1534_v19 = vadd.f32 %v3593_v63, %v4161_v14  ;;  %v1489_v18 = vpop.f32.mrb[61].mxu0  ;;  %v4793_v63 = vld [vmem:[#allocation27_spill] sm:$0xff] }
 0x35a   : > { %v1532_v50 = vadd.f32 %v1489_v18, %v4151_v4  ;;  %v3594_v53 = vpop.f32.mrb[62].mxu0  ;;  %v4795_v18 = vld [vmem:[#allocation30_spill] sm:$0xff] }
 0x35b   : > { %v1535_v60 = vadd.f32 %v3594_v53, %v4153_v31  ;;  %v1492_v1 = vpop.f32.mrb[63].mxu0  ;;  %v1566_v61 = vmax.f32 %v1534_v19, 0.0  ;;  %v4794_v19 = vld [vmem:[#allocation29_spill] sm:$0xff]  ;;  %v4797_v53 = vld [vmem:[#allocation32_spill] sm:$0xff] }
 0x35c   : > { %v1533_v26 = vadd.f32 %v1492_v1, %v4155_v6  ;;  %v1564_v42 = vmax.f32 %v1532_v50, 0.0  ;;  %v4796_v50 = vld [vmem:[#allocation31_spill] sm:$0xff] }
 0x35d   : > { %v1567_v58 = vmax.f32 %v1535_v60, 0.0  ;;  %v4798_v60 = vld [vmem:[#allocation33_spill] sm:$0xff] }
 0x35e   : > { %v1565_v56 = vmax.f32 %v1533_v26, 0.0 }
 0x35f   : > { %v1583_v28 = vpack.c.bf16 %v1567_v58, %v1566_v61 }
 0x360   : > { %v1582_v57 = vpack.c.bf16 %v1565_v56, %v1564_v42 }
 0x362   : > { %3205 = vmatprep.subr.bf16.mxu0 %v1582_v57 }
 0x363   : > { %3206 = vmatpush3.bf16.msra.mxu0 %v4396_v17  ;;  %v4784_v17 = vld [vmem:[#allocation16_spill] sm:$0xff] }
 0x364   : > { %3207 = vmatprep.subr.bf16.mxu0 %v1583_v28 }
 0x367   : > { %3208 = vmatpush3.bf16.msra.mxu0 %v4394_v33  ;;  %v4783_v33 = vld [vmem:[#allocation15_spill] sm:$0xff] }
 0x368   : > { %3643 = vmatprep.subr.bf16.mxu0 %v4174_v30 }
 0x36a   : > { %1617 = vmatmul.mubr.bf16.vlgmr.msra.gmra.mrb[64].mxu0 %v4188_v22  ;;  %v4773_v22 = vld [vmem:[#allocation6_spill] sm:$0xff] }
 0x36b   : > { %1624 = vmatprep.mubr.bf16.mxu0 %v4197_v25  ;;  %3644 = vmatpush3.bf16.msra.mxu0 %v4174_v30  ;;  %v4771_v30 = vld [vmem:[#allocation24_spill] sm:$0xff] }
 0x36c   : > { %3645 = vmatprep.subr.bf16.mxu0 %v4179_v34  ;;  %v4775_v25 = vld [vmem:[#allocation28_spill] sm:$0xff] }
 0x36f   : > { %3646 = vmatpush3.bf16.msra.mxu0 %v4179_v34  ;;  %v4772_v34 = vld [vmem:[#allocation25_spill] sm:$0xff] }
 0x370   : > { %3647 = vmatprep.subr.bf16.mxu0 %v4194_v24 }
 0x372   : > { %1625 = vmatmul.mubr.bf16.gmra.mrb[68].mxu0 %v4213_v29  ;;  %v4777_v29 = vld [vmem:[#allocation9_spill] sm:$0xff] }
 0x373   : > { %1632 = vmatprep.mubr.bf16.mxu0 %v4217_v36  ;;  %3648 = vmatpush3.bf16.msra.mxu0 %v4194_v24  ;;  %v4774_v24 = vld [vmem:[#allocation7_spill] sm:$0xff]  ;;  %v4778_v36 = vld [vmem:[#allocation10_spill] sm:$0xff] }
 0x374   : > { %3649 = vmatprep.subr.bf16.mxu0 %v4206_v35 }
 0x377   : > { %3650 = vmatpush3.bf16.msra.mxu0 %v4206_v35  ;;  %v4776_v35 = vld [vmem:[#allocation8_spill] sm:$0xff] }
 0x378   : > { %3651 = vmatprep.subr.bf16.mxu0 %v4302_v10 }
 0x37a   : > { %1633 = vmatmul.mubr.bf16.gmra.mrb[72].mxu0 %v4227_v37  ;;  %v4779_v37 = vld [vmem:[#allocation11_spill] sm:$0xff] }
 0x37b   : > { %1640 = vmatprep.mubr.bf16.mxu0 %v4230_v39  ;;  %3652 = vmatpush3.bf16.msra.mxu0 %v4302_v10  ;;  %v4780_v39 = vld [vmem:[#allocation12_spill] sm:$0xff]  ;;  %v4781_v10 = vld [vmem:[#allocation13_spill] sm:$0xff] }
 0x37c   : > { %3653 = vmatprep.subr.bf16.mxu0 %v4771_v30 }
 0x37f   : > { %3654 = vmatpush3.bf16.msra.mxu0 %v4771_v30 }
 0x380   : > { %3655 = vmatprep.subr.bf16.mxu0 %v4772_v34 }
 0x382   : > { %1641 = vmatmul.mubr.bf16.gmra.mrb[76].mxu0 %v4773_v22 }
 0x383   : > { %1648 = vmatprep.mubr.bf16.mxu0 %v4774_v24  ;;  %3656 = vmatpush3.bf16.msra.mxu0 %v4772_v34 }
 0x384   : > { %3657 = vmatprep.subr.bf16.mxu0 %v4775_v25 }
 0x387   : > { %3658 = vmatpush3.bf16.msra.mxu0 %v4775_v25 }
 0x38a   : > { %1649 = vmatmul.mubr.bf16.gmra.mrb[80].mxu0 %v4776_v35 }
 0x38b   : > { %1656 = vmatprep.mubr.bf16.mxu0 %v4777_v29 }
 0x392   : > { %1657 = vmatmul.mubr.bf16.gmra.mrb[84].mxu0 %v4778_v36 }
 0x393   : > { %1664 = vmatprep.mubr.bf16.mxu0 %v4779_v37 }
 0x39a   : > { %1665 = vmatmul.mubr.bf16.gmra.mrb[88].mxu0 %v4780_v39 }
 0x39b   : > { %1672 = vmatprep.mubr.bf16.mxu0 %v4781_v10 }
 0x3a2   : > { %1673 = vmatmul.mubr.bf16.gmra.mrb[92].mxu0 %v4782_v32 }
 0x3a3   : > { %1680 = vmatprep.mubr.bf16.mxu0 %v4783_v33 }
 0x3aa   : > { %1681 = vmatmul.mubr.bf16.gmra.mrb[96].mxu0 %v4784_v17 }
 0x3ab   : > { %1688 = vmatprep.mubr.bf16.mxu0 %v4785_v45 }
 0x3b2   : > { %1689 = vmatmul.mubr.bf16.gmra.mrb[100].mxu0 %v4786_v48 }
 0x3b3   : > { %1696 = vmatprep.mubr.bf16.mxu0 %v4787_v54 }
 0x3ba   : > { %1697 = vmatmul.mubr.bf16.gmra.mrb[104].mxu0 %v4788_v3 }
 0x3bb   : > { %1704 = vmatprep.mubr.bf16.mxu0 %v4789_v13 }
 0x3c2   : > { %1705 = vmatmul.mubr.bf16.gmra.mrb[108].mxu0 %v4790_v16 }
 0x3c3   : > { %1712 = vmatprep.mubr.bf16.mxu0 %v4791_v21 }
 0x3ca   : > { %1713 = vmatmul.mubr.bf16.gmra.mrb[112].mxu0 %v4792_v0 }
 0x3cb   : > { %1720 = vmatprep.mubr.bf16.mxu0 %v4793_v63 }
 0x3d2   : > { %1721 = vmatmul.mubr.bf16.gmra.mrb[116].mxu0 %v4794_v19 }
 0x3d3   : > { %1728 = vmatprep.mubr.bf16.mxu0 %v4795_v18 }
 0x3da   : > { %1729 = vmatmul.mubr.bf16.gmra.mrb[120].mxu0 %v4796_v50 }
 0x3db   : > { %1736 = vmatprep.mubr.bf16.mxu0 %v4797_v53 }
 0x3e2   : > { %1737 = vmatmul.mubr.bf16.gmra.mrb[124].mxu0 %v4798_v60 }
 0x43d   : > { %v3209_v1 = vpop.f32.mrb[64].mxu0 }
 0x43e   : > { %v3210_v26 = vpop.f32.mrb[65].mxu0 }
 0x43f   : > { %v3211_v61 = vadd.f32 %v3210_v26, %v3209_v1  ;;  %v3212_v58 = vpop.f32.mrb[66].mxu0 }
 0x440   : > { %v3213_v42 = vpop.f32.mrb[67].mxu0 }
 0x441   : > { %v3214_v56 = vadd.f32 %v3213_v42, %v3212_v58 }
 0x443   : > { %v1745_v28 = vpack.c.bf16 %v3214_v56, %v3211_v61 }
 0x445   : > { %v3215_v57 = vpop.f32.mrb[68].mxu0  ;;  %3611 = vmatprep.mubr.bf16.mxu1 %v1745_v28 }
 0x446   : > { %v3216_v30 = vpop.f32.mrb[69].mxu0 }
 0x447   : > { %v3217_v34 = vadd.f32 %v3216_v30, %v3215_v57  ;;  %v3218_v22 = vpop.f32.mrb[70].mxu0 }
 0x448   : > { %v3219_v24 = vpop.f32.mrb[71].mxu0 }
 0x449   : > { %v3220_v25 = vadd.f32 %v3219_v24, %v3218_v22 }
 0x44b   : > { %v1746_v35 = vpack.c.bf16 %v3220_v25, %v3217_v34 }
 0x44d   : > { %v3221_v29 = vpop.f32.mrb[72].mxu0  ;;  %3612 = vmatmul.mubr.bf16.vlgmr.msra.gmra.mrb[64].mxu1 %v1746_v35 }
 0x44e   : > { %v3222_v36 = vpop.f32.mrb[73].mxu0 }
 0x44f   : > { %v3223_v37 = vadd.f32 %v3222_v36, %v3221_v29  ;;  %v3224_v39 = vpop.f32.mrb[74].mxu0 }
 0x450   : > { %v3225_v10 = vpop.f32.mrb[75].mxu0 }
 0x451   : > { %v3226_v32 = vadd.f32 %v3225_v10, %v3224_v39 }
 0x453   : > { %v1747_v33 = vpack.c.bf16 %v3226_v32, %v3223_v37 }
 0x455   : > { %v3227_v17 = vpop.f32.mrb[76].mxu0  ;;  %3615 = vmatprep.mubr.bf16.mxu1 %v1747_v33 }
 0x456   : > { %v3228_v45 = vpop.f32.mrb[77].mxu0 }
 0x457   : > { %v3229_v48 = vadd.f32 %v3228_v45, %v3227_v17  ;;  %v3230_v54 = vpop.f32.mrb[78].mxu0 }
 0x458   : > { %v3231_v3 = vpop.f32.mrb[79].mxu0 }
 0x459   : > { %v3232_v13 = vadd.f32 %v3231_v3, %v3230_v54 }
 0x45b   : > { %v1748_v16 = vpack.c.bf16 %v3232_v13, %v3229_v48 }
 0x45d   : > { %v3233_v21 = vpop.f32.mrb[80].mxu0  ;;  %3616 = vmatmul.mubr.bf16.gmra.mrb[68].mxu1 %v1748_v16 }
 0x45e   : > { %v3234_v0 = vpop.f32.mrb[81].mxu0 }
 0x45f   : > { %v3235_v63 = vadd.f32 %v3234_v0, %v3233_v21  ;;  %v3236_v19 = vpop.f32.mrb[82].mxu0 }
 0x460   : > { %v3237_v18 = vpop.f32.mrb[83].mxu0 }
 0x461   : > { %v3238_v50 = vadd.f32 %v3237_v18, %v3236_v19 }
 0x463   : > { %v1749_v53 = vpack.c.bf16 %v3238_v50, %v3235_v63 }
 0x465   : > { %v3239_v60 = vpop.f32.mrb[84].mxu0  ;;  %3619 = vmatprep.mubr.bf16.mxu1 %v1749_v53 }
 0x466   : > { %v3240_v1 = vpop.f32.mrb[85].mxu0 }
 0x467   : > { %v3241_v26 = vadd.f32 %v3240_v1, %v3239_v60  ;;  %v3242_v61 = vpop.f32.mrb[86].mxu0 }
 0x468   : > { %v3243_v58 = vpop.f32.mrb[87].mxu0 }
 0x469   : > { %v3244_v42 = vadd.f32 %v3243_v58, %v3242_v61 }
 0x46b   : > { %v1750_v56 = vpack.c.bf16 %v3244_v42, %v3241_v26 }
 0x46d   : > { %v3245_v28 = vpop.f32.mrb[88].mxu0  ;;  %3620 = vmatmul.mubr.bf16.gmra.mrb[72].mxu1 %v1750_v56 }
 0x46e   : > { %v3246_v57 = vpop.f32.mrb[89].mxu0 }
 0x46f   : > { %v3247_v30 = vadd.f32 %v3246_v57, %v3245_v28  ;;  %v3248_v34 = vpop.f32.mrb[90].mxu0 }
 0x470   : > { %v3249_v22 = vpop.f32.mrb[91].mxu0 }
 0x471   : > { %v3250_v24 = vadd.f32 %v3249_v22, %v3248_v34 }
 0x473   : > { %v1751_v25 = vpack.c.bf16 %v3250_v24, %v3247_v30 }
 0x475   : > { %v3251_v35 = vpop.f32.mrb[92].mxu0  ;;  %3623 = vmatprep.mubr.bf16.mxu1 %v1751_v25 }
 0x476   : > { %v3252_v29 = vpop.f32.mrb[93].mxu0 }
 0x477   : > { %v3253_v36 = vadd.f32 %v3252_v29, %v3251_v35  ;;  %v3254_v37 = vpop.f32.mrb[94].mxu0 }
 0x478   : > { %v3255_v39 = vpop.f32.mrb[95].mxu0 }
 0x479   : > { %v3256_v10 = vadd.f32 %v3255_v39, %v3254_v37 }
 0x47b   : > { %v1752_v32 = vpack.c.bf16 %v3256_v10, %v3253_v36 }
 0x47d   : > { %v3257_v33 = vpop.f32.mrb[96].mxu0  ;;  %3624 = vmatmul.mubr.bf16.gmra.mrb[76].mxu1 %v1752_v32 }
 0x47e   : > { %v3258_v17 = vpop.f32.mrb[97].mxu0 }
 0x47f   : > { %v3259_v45 = vadd.f32 %v3258_v17, %v3257_v33  ;;  %v3260_v48 = vpop.f32.mrb[98].mxu0 }
 0x480   : > { %v3261_v54 = vpop.f32.mrb[99].mxu0 }
 0x481   : > { %v3262_v3 = vadd.f32 %v3261_v54, %v3260_v48 }
 0x483   : > { %v1753_v13 = vpack.c.bf16 %v3262_v3, %v3259_v45 }
 0x485   : > { %v3263_v16 = vpop.f32.mrb[100].mxu0  ;;  %3627 = vmatprep.mubr.bf16.mxu1 %v1753_v13 }
 0x486   : > { %v3264_v21 = vpop.f32.mrb[101].mxu0 }
 0x487   : > { %v3265_v0 = vadd.f32 %v3264_v21, %v3263_v16  ;;  %v3266_v63 = vpop.f32.mrb[102].mxu0 }
 0x488   : > { %v3267_v19 = vpop.f32.mrb[103].mxu0 }
 0x489   : > { %v3268_v18 = vadd.f32 %v3267_v19, %v3266_v63 }
 0x48b   : > { %v1754_v50 = vpack.c.bf16 %v3268_v18, %v3265_v0 }
 0x48d   : > { %v3269_v53 = vpop.f32.mrb[104].mxu0  ;;  %3628 = vmatmul.mubr.bf16.gmra.mrb[80].mxu1 %v1754_v50 }
 0x48e   : > { %v3270_v60 = vpop.f32.mrb[105].mxu0 }
 0x48f   : > { %v3271_v1 = vadd.f32 %v3270_v60, %v3269_v53  ;;  %v3272_v26 = vpop.f32.mrb[106].mxu0 }
 0x490   : > { %v3273_v61 = vpop.f32.mrb[107].mxu0 }
 0x491   : > { %v3274_v58 = vadd.f32 %v3273_v61, %v3272_v26 }
 0x493   : > { %v1755_v42 = vpack.c.bf16 %v3274_v58, %v3271_v1 }
 0x495   : > { %v3275_v56 = vpop.f32.mrb[108].mxu0  ;;  %3631 = vmatprep.mubr.bf16.mxu1 %v1755_v42  ;;  %v3845_v42 = vld [vmem:[%s4015_s21 + $0x4] ss:$8 sps:$4 sm:$0xff]  }
 0x496   : > { %v3276_v28 = vpop.f32.mrb[109].mxu0 }
 0x497   : > { %v3277_v57 = vadd.f32 %v3276_v28, %v3275_v56  ;;  %v3278_v30 = vpop.f32.mrb[110].mxu0 }
 0x498   : > { %v3279_v34 = vpop.f32.mrb[111].mxu0 }
 0x499   : > { %v3280_v22 = vadd.f32 %v3279_v34, %v3278_v30 }
 0x49b   : > { %v1756_v24 = vpack.c.bf16 %v3280_v22, %v3277_v57 }
 0x49d   : > { %v3281_v25 = vpop.f32.mrb[112].mxu0  ;;  %3632 = vmatmul.mubr.bf16.gmra.mrb[84].mxu1 %v1756_v24 }
 0x49e   : > { %v3282_v35 = vpop.f32.mrb[113].mxu0 }
 0x49f   : > { %v3283_v29 = vadd.f32 %v3282_v35, %v3281_v25  ;;  %v3284_v36 = vpop.f32.mrb[114].mxu0 }
 0x4a0   : > { %v3285_v37 = vpop.f32.mrb[115].mxu0 }
 0x4a1   : > { %v3286_v39 = vadd.f32 %v3285_v37, %v3284_v36 }
 0x4a3   : > { %v1757_v10 = vpack.c.bf16 %v3286_v39, %v3283_v29 }
 0x4a5   : > { %v3287_v32 = vpop.f32.mrb[116].mxu0  ;;  %3635 = vmatprep.mubr.bf16.mxu1 %v1757_v10 }
 0x4a6   : > { %v3288_v33 = vpop.f32.mrb[117].mxu0 }
 0x4a7   : > { %v3289_v17 = vadd.f32 %v3288_v33, %v3287_v32  ;;  %v3290_v45 = vpop.f32.mrb[118].mxu0 }
 0x4a8   : > { %v3291_v48 = vpop.f32.mrb[119].mxu0 }
 0x4a9   : > { %v3292_v54 = vadd.f32 %v3291_v48, %v3290_v45 }
 0x4ab   : > { %v1758_v3 = vpack.c.bf16 %v3292_v54, %v3289_v17 }
 0x4ad   : > { %v3293_v13 = vpop.f32.mrb[120].mxu0  ;;  %3636 = vmatmul.mubr.bf16.gmra.mrb[88].mxu1 %v1758_v3 }
 0x4ae   : > { %v3294_v16 = vpop.f32.mrb[121].mxu0 }
 0x4af   : > { %v3295_v21 = vadd.f32 %v3294_v16, %v3293_v13  ;;  %v3296_v0 = vpop.f32.mrb[122].mxu0 }
 0x4b0   : > { %v3297_v63 = vpop.f32.mrb[123].mxu0 }
 0x4b1   : > { %v3298_v19 = vadd.f32 %v3297_v63, %v3296_v0 }
 0x4b3   : > { %v1759_v18 = vpack.c.bf16 %v3298_v19, %v3295_v21 }
 0x4b5   : > { %v3299_v50 = vpop.f32.mrb[124].mxu0  ;;  %3639 = vmatprep.mubr.bf16.mxu1 %v1759_v18 }
 0x4b6   : > { %v3300_v53 = vpop.f32.mrb[125].mxu0 }
 0x4b7   : > { %v3301_v60 = vadd.f32 %v3300_v53, %v3299_v50  ;;  %v3302_v1 = vpop.f32.mrb[126].mxu0 }
 0x4b8   : > { %v3303_v26 = vpop.f32.mrb[127].mxu0 }
 0x4b9   : > { %v3304_v61 = vadd.f32 %v3303_v26, %v3302_v1 }
 0x4bb   : > { %v1760_v58 = vpack.c.bf16 %v3304_v61, %v3301_v60  ;;  %v4799_v61 = vld [vmem:[#allocation3_spill] sm:$0xff] }
 0x4bd   : > { %3640 = vmatmul.mubr.bf16.gmra.mrb[92].mxu1 %v1760_v58 }
 0x4be   : > { %2034 = vmatprep.mubr.bf16.mxu1 %v3845_v42 }
 0x520   : > { %v3613_v56 = vpop.f32.mrb[64].mxu1 }
 0x521   : > { %v1924_v28 = vadd.f32 %v3613_v56, %v4070_v62  ;;  %v1795_v57 = vpop.f32.mrb[65].mxu1 }
 0x522   : > { %v1922_v30 = vadd.f32 %v1795_v57, %v4056_v51  ;;  %v3614_v34 = vpop.f32.mrb[66].mxu1 }
 0x523   : > { %v1925_v22 = vadd.f32 %v3614_v34, %v4062_v55  ;;  %v1798_v24 = vpop.f32.mrb[67].mxu1  ;;  %v1956_v35 = vmax.f32 %v1924_v28, 0.0 }
 0x524   : > { %v1923_v25 = vadd.f32 %v1798_v24, %v4047_v46  ;;  %v1954_v36 = vmax.f32 %v1922_v30, 0.0 }
 0x525   : > { %v1957_v29 = vmax.f32 %v1925_v22, 0.0 }
 0x526   : > { %v1955_v37 = vmax.f32 %v1923_v25, 0.0 }
 0x527   : > { %v1987_v39 = vpack.c.bf16 %v1957_v29, %v1956_v35 }
 0x528   : > { %v1986_v10 = vpack.c.bf16 %v1955_v37, %v1954_v36  ;;  %v4800_v36 = vld [vmem:[#allocation4_spill] sm:$0xff] }
 0x530   : > { %v3617_v32 = vpop.f32.mrb[68].mxu1 }
 0x531   : > { %v1928_v33 = vadd.f32 %v3617_v32, %v4102_v23  ;;  %v1811_v17 = vpop.f32.mrb[69].mxu1 }
 0x532   : > { %v1926_v45 = vadd.f32 %v1811_v17, %v4088_v11  ;;  %v3618_v48 = vpop.f32.mrb[70].mxu1 }
 0x533   : > { %v1929_v54 = vadd.f32 %v3618_v48, %v4094_v15  ;;  %v1814_v3 = vpop.f32.mrb[71].mxu1  ;;  %v1960_v16 = vmax.f32 %v1928_v33, 0.0  ;;  %v4801_v33 = vld [vmem:[#allocation5_spill] sm:$0xff] }
 0x534   : > { %v1927_v13 = vadd.f32 %v1814_v3, %v4077_v5  ;;  %v1958_v0 = vmax.f32 %v1926_v45, 0.0 }
 0x535   : > { %v1961_v21 = vmax.f32 %v1929_v54, 0.0 }
 0x536   : > { %v1959_v63 = vmax.f32 %v1927_v13, 0.0 }
 0x537   : > { %v4475_v19 = vpack.c.bf16 %v1961_v21, %v1960_v16 }
 0x538   : > { %v1988_v18 = vpack.c.bf16 %v1959_v63, %v1958_v0 }
 0x540   : > { %v3621_v50 = vpop.f32.mrb[72].mxu1 }
 0x541   : > { %v1932_v53 = vadd.f32 %v3621_v50, %v4138_v59  ;;  %v1827_v60 = vpop.f32.mrb[73].mxu1 }
 0x542   : > { %v1930_v1 = vadd.f32 %v1827_v60, %v4123_v43  ;;  %v3622_v26 = vpop.f32.mrb[74].mxu1 }
 0x543   : > { %v1933_v58 = vadd.f32 %v3622_v26, %v4799_v61  ;;  %v1830_v42 = vpop.f32.mrb[75].mxu1  ;;  %v1964_v28 = vmax.f32 %v1932_v53, 0.0  ;;  %v4802_v26 = vld [vmem:[#allocation2_spill] sm:$0xff] }
 0x544   : > { %v1931_v56 = vadd.f32 %v1830_v42, %v4111_v38  ;;  %v1962_v30 = vmax.f32 %v1930_v1, 0.0 }
 0x545   : > { %v1965_v57 = vmax.f32 %v1933_v58, 0.0 }
 0x546   : > { %v1963_v34 = vmax.f32 %v1931_v56, 0.0 }
 0x547   : > { %v4481_v22 = vpack.c.bf16 %v1965_v57, %v1964_v28 }
 0x548   : > { %v4483_v24 = vpack.c.bf16 %v1963_v34, %v1962_v30 }
 0x550   : > { %v3625_v25 = vpop.f32.mrb[76].mxu1 }
 0x551   : > { %v1936_v35 = vadd.f32 %v3625_v25, %v4181_v20  ;;  %v1843_v29 = vpop.f32.mrb[77].mxu1 }
 0x552   : > { %v1934_v37 = vadd.f32 %v1843_v29, %v4800_v36  ;;  %v3626_v32 = vpop.f32.mrb[78].mxu1 }
 0x553   : > { %v1937_v17 = vadd.f32 %v3626_v32, %v4801_v33  ;;  %v1846_v45 = vpop.f32.mrb[79].mxu1  ;;  %v1968_v54 = vmax.f32 %v1936_v35, 0.0 }
 0x554   : > { %v1935_v48 = vadd.f32 %v1846_v45, %v4147_v2  ;;  %v1966_v13 = vmax.f32 %v1934_v37, 0.0 }
 0x555   : > { %v1969_v3 = vmax.f32 %v1937_v17, 0.0 }
 0x556   : > { %v1967_v16 = vmax.f32 %v1935_v48, 0.0 }
 0x557   : > { %v4489_v21 = vpack.c.bf16 %v1969_v3, %v1968_v54 }
 0x558   : > { %v4491_v0 = vpack.c.bf16 %v1967_v16, %v1966_v13 }
 0x560   : > { %v3629_v63 = vpop.f32.mrb[80].mxu1 }
 0x561   : > { %v1940_v50 = vadd.f32 %v3629_v63, %v4058_v52  ;;  %v1859_v53 = vpop.f32.mrb[81].mxu1 }
 0x562   : > { %v1938_v60 = vadd.f32 %v1859_v53, %v4049_v47  ;;  %v3630_v1 = vpop.f32.mrb[82].mxu1 }
 0x563   : > { %v1941_v58 = vadd.f32 %v3630_v1, %v4802_v26  ;;  %v1862_v42 = vpop.f32.mrb[83].mxu1  ;;  %v1972_v28 = vmax.f32 %v1940_v50, 0.0 }
 0x564   : > { %v1939_v56 = vadd.f32 %v1862_v42, %v4053_v49  ;;  %v1970_v30 = vmax.f32 %v1938_v60, 0.0 }
 0x565   : > { %v1973_v57 = vmax.f32 %v1941_v58, 0.0 }
 0x566   : > { %v1971_v34 = vmax.f32 %v1939_v56, 0.0 }
 0x567   : > { %v1995_v25 = vpack.c.bf16 %v1973_v57, %v1972_v28 }
 0x568   : > { %v1994_v35 = vpack.c.bf16 %v1971_v34, %v1970_v30 }
 0x56a   : > { %3329 = vmatprep.subr.bf16.mxu1 %v1994_v35 }
 0x56b   : > { %3330 = vmatpush3.bf16.msra.mxu1 %v1986_v10 }
 0x56c   : > { %3331 = vmatprep.subr.bf16.mxu1 %v1995_v25 }
 0x56f   : > { %3332 = vmatpush3.bf16.msra.mxu1 %v1987_v39 }
 0x570   : > { %v3633_v29 = vpop.f32.mrb[84].mxu1 }
 0x571   : > { %v1944_v37 = vadd.f32 %v3633_v29, %v4090_v12  ;;  %v1875_v32 = vpop.f32.mrb[85].mxu1 }
 0x572   : > { %v1942_v17 = vadd.f32 %v1875_v32, %v4081_v7  ;;  %v3634_v45 = vpop.f32.mrb[86].mxu1 }
 0x573   : > { %v1945_v48 = vadd.f32 %v3634_v45, %v4083_v8  ;;  %v1878_v54 = vpop.f32.mrb[87].mxu1  ;;  %v1976_v13 = vmax.f32 %v1944_v37, 0.0 }
 0x574   : > { %v1943_v3 = vadd.f32 %v1878_v54, %v4085_v9  ;;  %v1974_v63 = vmax.f32 %v1942_v17, 0.0 }
 0x575   : > { %v1977_v16 = vmax.f32 %v1945_v48, 0.0 }
 0x576   : > { %v1975_v50 = vmax.f32 %v1943_v3, 0.0 }
 0x577   : > { %v1997_v53 = vpack.c.bf16 %v1977_v16, %v1976_v13 }
 0x578   : > { %v1996_v10 = vpack.c.bf16 %v1975_v50, %v1974_v63 }
 0x57a   : > { %3333 = vmatprep.subr.bf16.mxu1 %v1996_v10  ;;  %v3847_v10 = vld [vmem:[%s4015_s21 + $0x14] ss:$8 sps:$4 sm:$0xff]  }
 0x57b   : > { %3334 = vmatpush3.bf16.msra.mxu1 %v1988_v18 }
 0x57c   : > { %3335 = vmatprep.subr.bf16.mxu1 %v1997_v53  ;;  %v3846_v53 = vld [vmem:[%s4015_s21] ss:$8 sps:$4 sm:$0xff]  }
 0x57f   : > { %3336 = vmatpush3.bf16.msra.mxu1 %v4475_v19 }
 0x580   : > { %v3637_v39 = vpop.f32.mrb[88].mxu1 }
 0x581   : > { %v1948_v60 = vadd.f32 %v3637_v39, %v4125_v44  ;;  %v1891_v1 = vpop.f32.mrb[89].mxu1  ;;  %v3848_v39 = vld [vmem:[%s4015_s21 + $0x10] ss:$8 sps:$4 sm:$0xff]  }
 0x582   : > { %v1946_v58 = vadd.f32 %v1891_v1, %v4115_v40  ;;  %v3638_v42 = vpop.f32.mrb[90].mxu1  ;;  %v3850_v1 = vld [vmem:[%s4015_s21 + $0x20] ss:$8 sps:$4 sm:$0xff]  }
 0x583   : > { %v1949_v56 = vadd.f32 %v3638_v42, %v4117_v27  ;;  %v1894_v28 = vpop.f32.mrb[91].mxu1  ;;  %v1980_v30 = vmax.f32 %v1948_v60, 0.0  ;;  %v3849_v60 = vld [vmem:[%s4015_s21 + $0x24] ss:$8 sps:$4 sm:$0xff]   ;;  %v3854_v42 = vld [vmem:[%s4015_s21 + $0x40] ss:$8 sps:$4 sm:$0xff]  }
 0x584   : > { %v1947_v57 = vadd.f32 %v1894_v28, %v4119_v41  ;;  %v1978_v25 = vmax.f32 %v1946_v58, 0.0  ;;  %v3852_v58 = vld [vmem:[%s4015_s21 + $0x30] ss:$8 sps:$4 sm:$0xff]  }
 0x585   : > { %v1981_v34 = vmax.f32 %v1949_v56, 0.0  ;;  %v3855_v56 = vld [vmem:[%s4015_s21 + $0x54] ss:$8 sps:$4 sm:$0xff]   ;;  %v3856_v28 = vld [vmem:[%s4015_s21 + $0x50] ss:$8 sps:$4 sm:$0xff]  }
 0x586   : > { %v1979_v35 = vmax.f32 %v1947_v57, 0.0  ;;  %v3857_v57 = vld [vmem:[%s4015_s21 + $0x64] ss:$8 sps:$4 sm:$0xff]  }
 0x587   : > { %v1999_v18 = vpack.c.bf16 %v1981_v34, %v1980_v30  ;;  %v3858_v30 = vld [vmem:[%s4015_s21 + $0x60] ss:$8 sps:$4 sm:$0xff]   ;;  %v3859_v34 = vld [vmem:[%s4015_s21 + $0x74] ss:$8 sps:$4 sm:$0xff]  }
 0x588   : > { %v1998_v29 = vpack.c.bf16 %v1979_v35, %v1978_v25  ;;  %v3860_v25 = vld [vmem:[%s4015_s21 + $0x70] ss:$8 sps:$4 sm:$0xff]   ;;  %v3861_v35 = vld [vmem:[%s4015_s21 + $0x84] ss:$8 sps:$4 sm:$0xff]  }
 0x58a   : > { %3337 = vmatprep.subr.bf16.mxu1 %v1998_v29  ;;  %v3863_v29 = vld [vmem:[%s4015_s21 + $0x94] ss:$8 sps:$4 sm:$0xff]  }
 0x58b   : > { %3338 = vmatpush3.bf16.msra.mxu1 %v4483_v24 }
 0x58c   : > { %3339 = vmatprep.subr.bf16.mxu1 %v1999_v18  ;;  %v3862_v18 = vld [vmem:[%s4015_s21 + $0x80] ss:$8 sps:$4 sm:$0xff]  }
 0x58f   : > { %3340 = vmatpush3.bf16.msra.mxu1 %v4481_v22 }
 0x590   : > { %v3641_v19 = vpop.f32.mrb[92].mxu1 }
 0x591   : > { %v1952_v37 = vadd.f32 %v3641_v19, %v4161_v14  ;;  %v1907_v32 = vpop.f32.mrb[93].mxu1  ;;  %v3864_v19 = vld [vmem:[%s4015_s21 + $0x90] ss:$8 sps:$4 sm:$0xff]  }
 0x592   : > { %v1950_v17 = vadd.f32 %v1907_v32, %v4151_v4  ;;  %v3642_v45 = vpop.f32.mrb[94].mxu1  ;;  %v3866_v32 = vld [vmem:[%s4015_s21 + $0xa0] ss:$8 sps:$4 sm:$0xff]  }
 0x593   : > { %v1953_v48 = vadd.f32 %v3642_v45, %v4153_v31  ;;  %v1910_v54 = vpop.f32.mrb[95].mxu1  ;;  %v1984_v13 = vmax.f32 %v1952_v37, 0.0  ;;  %v3865_v37 = vld [vmem:[%s4015_s21 + $0xa4] ss:$8 sps:$4 sm:$0xff]   ;;  %v3868_v45 = vld [vmem:[%s4015_s21 + $0xb0] ss:$8 sps:$4 sm:$0xff]  }
 0x594   : > { %v1951_v3 = vadd.f32 %v1910_v54, %v4155_v6  ;;  %v1982_v16 = vmax.f32 %v1950_v17, 0.0  ;;  %v3867_v17 = vld [vmem:[%s4015_s21 + $0xb4] ss:$8 sps:$4 sm:$0xff]   ;;  %v3870_v54 = vld [vmem:[%s4015_s21 + $0xc0] ss:$8 sps:$4 sm:$0xff]  }
 0x595   : > { %v1985_v24 = vmax.f32 %v1953_v48, 0.0  ;;  %v3869_v48 = vld [vmem:[%s4015_s21 + $0xc4] ss:$8 sps:$4 sm:$0xff]  }
 0x596   : > { %v1983_v22 = vmax.f32 %v1951_v3, 0.0  ;;  %v3871_v3 = vld [vmem:[%s4015_s21 + $0xd4] ss:$8 sps:$4 sm:$0xff]  }
 0x597   : > { %v2001_v63 = vpack.c.bf16 %v1985_v24, %v1984_v13  ;;  %v3872_v13 = vld [vmem:[%s4015_s21 + $0xd0] ss:$8 sps:$4 sm:$0xff]   ;;  %v3873_v24 = vld [vmem:[%s4015_s21 + $0xe4] ss:$8 sps:$4 sm:$0xff]  }
 0x598   : > { %v2000_v50 = vpack.c.bf16 %v1983_v22, %v1982_v16  ;;  %v3874_v16 = vld [vmem:[%s4015_s21 + $0xe0] ss:$8 sps:$4 sm:$0xff]   ;;  %v3875_v22 = vld [vmem:[%s4015_s21 + $0xf4] ss:$8 sps:$4 sm:$0xff]  }
 0x59a   : > { %3341 = vmatprep.subr.bf16.mxu1 %v2000_v50 }
 0x59b   : > { %3342 = vmatpush3.bf16.msra.mxu1 %v4491_v0  ;;  %v3851_v0 = vld [vmem:[%s4015_s21 + $0x34] ss:$8 sps:$4 sm:$0xff]  }
 0x59c   : > { %3343 = vmatprep.subr.bf16.mxu1 %v2001_v63  ;;  %v3876_v63 = vld [vmem:[%s4015_s21 + $0xf0] ss:$8 sps:$4 sm:$0xff]  }
 0x59f   : > { %3344 = vmatpush3.bf16.msra.mxu1 %v4489_v21  ;;  %v3853_v21 = vld [vmem:[%s4015_s21 + $0x44] ss:$8 sps:$4 sm:$0xff]   ;;  %s4546_s21 = sshll.u32 %s4009_s17, 5 }
 0x5a0   : > { %s4552_s14 = scalar_lea.vmem %s4688_s2, %s4546_s21  ;;  %s512_s16 = scalar_lea.vmem %s4689_s3, %s4546_s21 }
 0x5a2   : > { %2035 = vmatmul.mubr.bf16.vlgmr.msra.gmra.mrb[96].mxu1 %v3846_v53 }
 0x5a3   : > { %2042 = vmatprep.mubr.bf16.mxu1 %v3847_v10 }
 0x5aa   : > { %2043 = vmatmul.mubr.bf16.gmra.mrb[100].mxu1 %v3848_v39 }
 0x5ab   : > { %2050 = vmatprep.mubr.bf16.mxu1 %v3849_v60 }
 0x5b2   : > { %2051 = vmatmul.mubr.bf16.gmra.mrb[104].mxu1 %v3850_v1 }
 0x5b3   : > { %2058 = vmatprep.mubr.bf16.mxu1 %v3851_v0 }
 0x5ba   : > { %2059 = vmatmul.mubr.bf16.gmra.mrb[108].mxu1 %v3852_v58 }
 0x5bb   : > { %2066 = vmatprep.mubr.bf16.mxu1 %v3853_v21 }
 0x5c2   : > { %2067 = vmatmul.mubr.bf16.gmra.mrb[112].mxu1 %v3854_v42 }
 0x5c3   : > { %2074 = vmatprep.mubr.bf16.mxu1 %v3855_v56 }
 0x5ca   : > { %2075 = vmatmul.mubr.bf16.gmra.mrb[116].mxu1 %v3856_v28 }
 0x5cb   : > { %2082 = vmatprep.mubr.bf16.mxu1 %v3857_v57 }
 0x5d2   : > { %2083 = vmatmul.mubr.bf16.gmra.mrb[120].mxu1 %v3858_v30 }
 0x5d3   : > { %2090 = vmatprep.mubr.bf16.mxu1 %v3859_v34 }
 0x5da   : > { %2091 = vmatmul.mubr.bf16.gmra.mrb[124].mxu1 %v3860_v25 }
 0x5db   : > { %2098 = vmatprep.mubr.bf16.mxu1 %v3861_v35 }
 0x5e2   : > { %2099 = vmatmul.mubr.bf16.gmra.mrb[128].mxu1 %v3862_v18 }
 0x5e3   : > { %2106 = vmatprep.mubr.bf16.mxu1 %v3863_v29 }
 0x5ea   : > { %2107 = vmatmul.mubr.bf16.gmra.mrb[132].mxu1 %v3864_v19 }
 0x5eb   : > { %2114 = vmatprep.mubr.bf16.mxu1 %v3865_v37 }
 0x5f2   : > { %2115 = vmatmul.mubr.bf16.gmra.mrb[136].mxu1 %v3866_v32 }
 0x5f3   : > { %2122 = vmatprep.mubr.bf16.mxu1 %v3867_v17 }
 0x5fa   : > { %2123 = vmatmul.mubr.bf16.gmra.mrb[140].mxu1 %v3868_v45 }
 0x5fb   : > { %2130 = vmatprep.mubr.bf16.mxu1 %v3869_v48 }
 0x602   : > { %2131 = vmatmul.mubr.bf16.gmra.mrb[144].mxu1 %v3870_v54 }
 0x603   : > { %2138 = vmatprep.mubr.bf16.mxu1 %v3871_v3 }
 0x60a   : > { %2139 = vmatmul.mubr.bf16.gmra.mrb[148].mxu1 %v3872_v13 }
 0x60b   : > { %2146 = vmatprep.mubr.bf16.mxu1 %v3873_v24 }
 0x612   : > { %2147 = vmatmul.mubr.bf16.gmra.mrb[152].mxu1 %v3874_v16 }
 0x613   : > { %2154 = vmatprep.mubr.bf16.mxu1 %v3875_v22 }
 0x61a   : > { %2155 = vmatmul.mubr.bf16.gmra.mrb[156].mxu1 %v3876_v63 }
 0x675   : > { %v3345_v50 = vpop.f32.mrb[96].mxu1 }
 0x676   : > { %v3346_v53 = vpop.f32.mrb[97].mxu1 }
 0x677   : > { %v3347_v10 = vadd.f32 %v3346_v53, %v3345_v50  ;;  %v3348_v39 = vpop.f32.mrb[98].mxu1 }
 0x678   : > { %v3349_v60 = vpop.f32.mrb[99].mxu1 }
 0x679   : > { %v3350_v1 = vadd.f32 %v3349_v60, %v3348_v39 }
 0x67b   : > { %v2163_v0 = vpack.c.bf16 %v3350_v1, %v3347_v10 }
 0x67d   : > { %v3351_v58 = vpop.f32.mrb[100].mxu1  ;;  %3659 = vmatprep.mubr.bf16.mxu0 %v2163_v0 }
 0x67e   : > { %v3352_v21 = vpop.f32.mrb[101].mxu1 }
 0x67f   : > { %v3353_v42 = vadd.f32 %v3352_v21, %v3351_v58  ;;  %v3354_v56 = vpop.f32.mrb[102].mxu1 }
 0x680   : > { %v3355_v28 = vpop.f32.mrb[103].mxu1 }
 0x681   : > { %v3356_v57 = vadd.f32 %v3355_v28, %v3354_v56 }
 0x683   : > { %v2164_v30 = vpack.c.bf16 %v3356_v57, %v3353_v42 }
 0x685   : > { %v3357_v34 = vpop.f32.mrb[104].mxu1  ;;  %3660 = vmatmul.mubr.bf16.vlgmr.msra.gmra.mrb[128].mxu0 %v2164_v30 }
 0x686   : > { %v3358_v25 = vpop.f32.mrb[105].mxu1 }
 0x687   : > { %v3359_v35 = vadd.f32 %v3358_v25, %v3357_v34  ;;  %v3360_v18 = vpop.f32.mrb[106].mxu1 }
 0x688   : > { %v3361_v29 = vpop.f32.mrb[107].mxu1 }
 0x689   : > { %v3362_v19 = vadd.f32 %v3361_v29, %v3360_v18 }
 0x68b   : > { %v2165_v37 = vpack.c.bf16 %v3362_v19, %v3359_v35 }
 0x68d   : > { %v3363_v32 = vpop.f32.mrb[108].mxu1  ;;  %3663 = vmatprep.mubr.bf16.mxu0 %v2165_v37 }
 0x68e   : > { %v3364_v17 = vpop.f32.mrb[109].mxu1 }
 0x68f   : > { %v3365_v45 = vadd.f32 %v3364_v17, %v3363_v32  ;;  %v3366_v48 = vpop.f32.mrb[110].mxu1 }
 0x690   : > { %v3367_v54 = vpop.f32.mrb[111].mxu1 }
 0x691   : > { %v3368_v3 = vadd.f32 %v3367_v54, %v3366_v48 }
 0x693   : > { %v2166_v13 = vpack.c.bf16 %v3368_v3, %v3365_v45 }
 0x695   : > { %v3369_v24 = vpop.f32.mrb[112].mxu1  ;;  %3664 = vmatmul.mubr.bf16.gmra.mrb[132].mxu0 %v2166_v13 }
 0x696   : > { %v3370_v16 = vpop.f32.mrb[113].mxu1 }
 0x697   : > { %v3371_v22 = vadd.f32 %v3370_v16, %v3369_v24  ;;  %v3372_v63 = vpop.f32.mrb[114].mxu1 }
 0x698   : > { %v3373_v50 = vpop.f32.mrb[115].mxu1 }
 0x699   : > { %v3374_v53 = vadd.f32 %v3373_v50, %v3372_v63 }
 0x69b   : > { %v2167_v10 = vpack.c.bf16 %v3374_v53, %v3371_v22 }
 0x69d   : > { %v3375_v39 = vpop.f32.mrb[116].mxu1  ;;  %3667 = vmatprep.mubr.bf16.mxu0 %v2167_v10 }
 0x69e   : > { %v3376_v60 = vpop.f32.mrb[117].mxu1 }
 0x69f   : > { %v3377_v1 = vadd.f32 %v3376_v60, %v3375_v39  ;;  %v3378_v0 = vpop.f32.mrb[118].mxu1 }
 0x6a0   : > { %v3379_v58 = vpop.f32.mrb[119].mxu1 }
 0x6a1   : > { %v3380_v21 = vadd.f32 %v3379_v58, %v3378_v0 }
 0x6a3   : > { %v2168_v42 = vpack.c.bf16 %v3380_v21, %v3377_v1 }
 0x6a5   : > { %v3381_v56 = vpop.f32.mrb[120].mxu1  ;;  %3668 = vmatmul.mubr.bf16.gmra.mrb[136].mxu0 %v2168_v42 }
 0x6a6   : > { %v3382_v28 = vpop.f32.mrb[121].mxu1 }
 0x6a7   : > { %v3383_v57 = vadd.f32 %v3382_v28, %v3381_v56  ;;  %v3384_v30 = vpop.f32.mrb[122].mxu1 }
 0x6a8   : > { %v3385_v34 = vpop.f32.mrb[123].mxu1 }
 0x6a9   : > { %v3386_v25 = vadd.f32 %v3385_v34, %v3384_v30 }
 0x6ab   : > { %v2169_v35 = vpack.c.bf16 %v3386_v25, %v3383_v57 }
 0x6ad   : > { %v3387_v18 = vpop.f32.mrb[124].mxu1  ;;  %3671 = vmatprep.mubr.bf16.mxu0 %v2169_v35 }
 0x6ae   : > { %v3388_v29 = vpop.f32.mrb[125].mxu1 }
 0x6af   : > { %v3389_v19 = vadd.f32 %v3388_v29, %v3387_v18  ;;  %v3390_v37 = vpop.f32.mrb[126].mxu1 }
 0x6b0   : > { %v3391_v32 = vpop.f32.mrb[127].mxu1 }
 0x6b1   : > { %v3392_v17 = vadd.f32 %v3391_v32, %v3390_v37 }
 0x6b3   : > { %v2170_v45 = vpack.c.bf16 %v3392_v17, %v3389_v19 }
 0x6b5   : > { %v3393_v48 = vpop.f32.mrb[128].mxu1  ;;  %3672 = vmatmul.mubr.bf16.gmra.mrb[140].mxu0 %v2170_v45 }
 0x6b6   : > { %v3394_v54 = vpop.f32.mrb[129].mxu1 }
 0x6b7   : > { %v3395_v3 = vadd.f32 %v3394_v54, %v3393_v48  ;;  %v3396_v13 = vpop.f32.mrb[130].mxu1 }
 0x6b8   : > { %v3397_v24 = vpop.f32.mrb[131].mxu1 }
 0x6b9   : > { %v3398_v16 = vadd.f32 %v3397_v24, %v3396_v13 }
 0x6bb   : > { %v2171_v22 = vpack.c.bf16 %v3398_v16, %v3395_v3 }
 0x6bd   : > { %v3399_v63 = vpop.f32.mrb[132].mxu1  ;;  %3675 = vmatprep.mubr.bf16.mxu0 %v2171_v22 }
 0x6be   : > { %v3400_v50 = vpop.f32.mrb[133].mxu1 }
 0x6bf   : > { %v3401_v53 = vadd.f32 %v3400_v50, %v3399_v63  ;;  %v3402_v10 = vpop.f32.mrb[134].mxu1 }
 0x6c0   : > { %v3403_v39 = vpop.f32.mrb[135].mxu1 }
 0x6c1   : > { %v3404_v60 = vadd.f32 %v3403_v39, %v3402_v10 }
 0x6c3   : > { %v2172_v1 = vpack.c.bf16 %v3404_v60, %v3401_v53 }
 0x6c5   : > { %v3405_v0 = vpop.f32.mrb[136].mxu1  ;;  %3676 = vmatmul.mubr.bf16.gmra.mrb[144].mxu0 %v2172_v1 }
 0x6c6   : > { %v3406_v58 = vpop.f32.mrb[137].mxu1 }
 0x6c7   : > { %v3407_v21 = vadd.f32 %v3406_v58, %v3405_v0  ;;  %v3408_v42 = vpop.f32.mrb[138].mxu1 }
 0x6c8   : > { %v3409_v56 = vpop.f32.mrb[139].mxu1 }
 0x6c9   : > { %v3410_v28 = vadd.f32 %v3409_v56, %v3408_v42 }
 0x6cb   : > { %v2173_v57 = vpack.c.bf16 %v3410_v28, %v3407_v21 }
 0x6cd   : > { %v3411_v30 = vpop.f32.mrb[140].mxu1  ;;  %3679 = vmatprep.mubr.bf16.mxu0 %v2173_v57 }
 0x6ce   : > { %v3412_v34 = vpop.f32.mrb[141].mxu1 }
 0x6cf   : > { %v3413_v25 = vadd.f32 %v3412_v34, %v3411_v30  ;;  %v3414_v35 = vpop.f32.mrb[142].mxu1 }
 0x6d0   : > { %v3415_v18 = vpop.f32.mrb[143].mxu1 }
 0x6d1   : > { %v3416_v29 = vadd.f32 %v3415_v18, %v3414_v35  ;;  %v3817_v18 = vld [vmem:[%s4552_s14 + $0x4] ss:$8 sps:$4 sm:$0xff]  }
 0x6d3   : > { %v2174_v19 = vpack.c.bf16 %v3416_v29, %v3413_v25 }
 0x6d5   : > { %v3417_v37 = vpop.f32.mrb[144].mxu1  ;;  %3680 = vmatmul.mubr.bf16.gmra.mrb[148].mxu0 %v2174_v19 }
 0x6d6   : > { %v3418_v32 = vpop.f32.mrb[145].mxu1 }
 0x6d7   : > { %v3419_v17 = vadd.f32 %v3418_v32, %v3417_v37  ;;  %v3420_v45 = vpop.f32.mrb[146].mxu1 }
 0x6d8   : > { %v3421_v48 = vpop.f32.mrb[147].mxu1 }
 0x6d9   : > { %v3422_v54 = vadd.f32 %v3421_v48, %v3420_v45 }
 0x6db   : > { %v2175_v3 = vpack.c.bf16 %v3422_v54, %v3419_v17 }
 0x6dd   : > { %v3423_v13 = vpop.f32.mrb[148].mxu1  ;;  %3683 = vmatprep.mubr.bf16.mxu0 %v2175_v3 }
 0x6de   : > { %v3424_v24 = vpop.f32.mrb[149].mxu1 }
 0x6df   : > { %v3425_v16 = vadd.f32 %v3424_v24, %v3423_v13  ;;  %v3426_v22 = vpop.f32.mrb[150].mxu1 }
 0x6e0   : > { %v3427_v63 = vpop.f32.mrb[151].mxu1 }
 0x6e1   : > { %v3428_v50 = vadd.f32 %v3427_v63, %v3426_v22  ;;  %v2493_v22 = vld [vmem:[%s512_s16] sm:$0xff]  ;;  %v2495_v63 = vld [vmem:[%s512_s16 + $0x10] sm:$0xff] }
 0x6e2   : > { %3837 = vrcp.f32 %v2493_v22 }
 0x6e3   : > { %v2176_v53 = vpack.c.bf16 %v3428_v50, %v3425_v16  ;;  %v3885_v50 = vmov 0   ;;  %3839 = vrcp.f32 %v2495_v63 }
 0x6e4   : > { %3740 = vset.pattern.permute.xlu0 %v3885_v50  ;;  %3741 = vset.pattern.permute.xlu1 %v3885_v50 }
 0x6e5   : > { %v3429_v10 = vpop.f32.mrb[152].mxu1  ;;  %3684 = vmatmul.mubr.bf16.gmra.mrb[152].mxu0 %v2176_v53  ;;  %v3822_v53 = vld [vmem:[%s4694_s8 + $0x8] sm:$0xff]  }
 0x6e6   : > { %v3430_v39 = vpop.f32.mrb[153].mxu1 }
 0x6e7   : > { %v3431_v60 = vadd.f32 %v3430_v39, %v3429_v10  ;;  %v3432_v1 = vpop.f32.mrb[154].mxu1  ;;  %v3823_v10 = vld [vmem:[%s4694_s8 + $0x10] sm:$0xff]  }
 0x6e8   : > { %v3433_v0 = vpop.f32.mrb[155].mxu1 }
 0x6e9   : > { %v3434_v58 = vadd.f32 %v3433_v0, %v3432_v1 }
 0x6eb   : > { %v2177_v21 = vpack.c.bf16 %v3434_v58, %v3431_v60 }
 0x6ed   : > { %v3435_v42 = vpop.f32.mrb[156].mxu1  ;;  %3687 = vmatprep.mubr.bf16.mxu0 %v2177_v21  ;;  %v3824_v21 = vld [vmem:[%s4694_s8 + $0x18] sm:$0xff]  }
 0x6ee   : > { %v3436_v56 = vpop.f32.mrb[157].mxu1 }
 0x6ef   : > { %v3437_v28 = vadd.f32 %v3436_v56, %v3435_v42  ;;  %v3438_v57 = vpop.f32.mrb[158].mxu1 }
 0x6f0   : > { %v3439_v30 = vpop.f32.mrb[159].mxu1 }
 0x6f1   : > { %v3440_v34 = vadd.f32 %v3439_v30, %v3438_v57  ;;  %v3838_v57 = vpop.eup %3837 }
 0x6f2   : > { %2503 = vperm.xlu0 %3740, %v3838_v57  }
 0x6f3   : > { %v2178_v25 = vpack.c.bf16 %v3440_v34, %v3437_v28 }
 0x6f5   : > { %3688 = vmatmul.mubr.bf16.gmra.mrb[156].mxu0 %v2178_v25 }
 0x6f6   : > { %2476 = vmatprep.mubr.bf16.mxu0 %v3817_v18 }
 0x758   : > { %v3661_v35 = vpop.f32.mrb[128].mxu0 }
 0x759   : > { %v2342_v29 = vadd.f32 %v3661_v35, %v4070_v62  ;;  %v2213_v19 = vpop.f32.mrb[129].mxu0 }
 0x75a   : > { %v2340_v37 = vadd.f32 %v2213_v19, %v4056_v51  ;;  %v3662_v32 = vpop.f32.mrb[130].mxu0  ;;  %v2494_v51 = vld [vmem:[%s512_s16 + $0x8] sm:$0xff] }
 0x75b   : > { %v2343_v17 = vadd.f32 %v3662_v32, %v4062_v55  ;;  %v2216_v45 = vpop.f32.mrb[131].mxu0  ;;  %v2374_v54 = vmax.f32 %v2342_v29, 0.0  ;;  %v3821_v55 = vld [vmem:[%s4694_s8] sm:$0xff]   ;;  %3841 = vrcp.f32 %v2494_v51  ;;  %v3826_v19 = vld [vmem:[%s4694_s8 + $0x28] sm:$0xff]  }
 0x75c   : > { %v2341_v48 = vadd.f32 %v2216_v45, %v4047_v46  ;;  %v2372_v13 = vmax.f32 %v2340_v37, 0.0  ;;  %v2496_v46 = vld [vmem:[%s512_s16 + $0x18] sm:$0xff]  ;;  %3691 = vmatprep.subr.bf16.mxu1 %v3821_v55  ;;  %s517_s16 = scalar_lea.vmem %s4690_s4, %s4546_s21 }
 0x75d   : > { %v2375_v3 = vmax.f32 %v2343_v17, 0.0  ;;  %3692 = vmatpush3.bf16.msra.mxu1 %v3821_v55  ;;  %3843 = vrcp.f32 %v2496_v46  ;;  %v2543_v37 = vld [vmem:[%s517_s16] sm:$0xff]  ;;  %v2544_v32 = vld [vmem:[%s517_s16 + $0x8] sm:$0xff]  ;;  %v3827_v17 = vld [vmem:[%s4694_s8 + $0x30] sm:$0xff]  }
 0x75e   : > { %v2373_v24 = vmax.f32 %v2341_v48, 0.0  ;;  %3693 = vmatprep.subr.bf16.mxu1 %v3822_v53  ;;  %v2545_v45 = vld [vmem:[%s517_s16 + $0x10] sm:$0xff] }
 0x75f   : > { %v4559_v16 = vpack.c.bf16 %v2375_v3, %v2374_v54  ;;  %v2546_v54 = vld [vmem:[%s517_s16 + $0x18] sm:$0xff] }
 0x760   : > { %v4565_v62 = vpack.c.bf16 %v2373_v24, %v2372_v13 }
 0x761   : > { %3694 = vmatpush3.bf16.msra.mxu1 %v3822_v53 }
 0x762   : > { %3695 = vmatprep.subr.bf16.mxu1 %v3823_v10 }
 0x765   : > { %3696 = vmatpush3.bf16.msra.mxu1 %v3823_v10 }
 0x766   : > { %3697 = vmatprep.subr.bf16.mxu1 %v3824_v21 }
 0x768   : > { %v3665_v39 = vpop.f32.mrb[132].mxu0 }
 0x769   : > { %v2346_v60 = vadd.f32 %v3665_v39, %v4102_v23  ;;  %v2229_v1 = vpop.f32.mrb[133].mxu0  ;;  %v3840_v23 = vpop.eup %3839  ;;  %3698 = vmatpush3.bf16.msra.mxu1 %v3824_v21 }
 0x76a   : > { %v2344_v0 = vadd.f32 %v2229_v1, %v4088_v11  ;;  %v3666_v58 = vpop.f32.mrb[134].mxu0  ;;  %v3825_v11 = vld [vmem:[%s4694_s8 + $0x20] sm:$0xff]   ;;  %v3842_v18 = vpop.eup %3841  ;;  %2513 = vperm.xlu1 %3741, %v3840_v23  }
 0x76b   : > { %v2347_v42 = vadd.f32 %v3666_v58, %v4094_v15  ;;  %v2232_v56 = vpop.f32.mrb[135].mxu0  ;;  %v2378_v30 = vmax.f32 %v2346_v60, 0.0  ;;  %v3844_v15 = vpop.eup %3843  ;;  %2508 = vperm.xlu0 %3740, %v3842_v18   ;;  %3699 = vmatprep.subr.bf16.mxu1 %v3825_v11 }
 0x76c   : > { %v2345_v28 = vadd.f32 %v2232_v56, %v4077_v5  ;;  %v2376_v25 = vmax.f32 %v2344_v0, 0.0 }
 0x76d   : > { %v2379_v34 = vmax.f32 %v2347_v42, 0.0  ;;  %3700 = vmatpush3.bf16.msra.mxu1 %v3825_v11 }
 0x76e   : > { %v2377_v35 = vmax.f32 %v2345_v28, 0.0  ;;  %2518 = vperm.xlu1 %3741, %v3844_v15   ;;  %3701 = vmatprep.subr.bf16.mxu1 %v3826_v19 }
 0x76f   : > { %v4586_v29 = vpack.c.bf16 %v2379_v34, %v2378_v30  ;;  %2550 = vperm.xlu0 %3740, %v2543_v37  }
 0x770   : > { %v4588_v5 = vpack.c.bf16 %v2377_v35, %v2376_v25 }
 0x771   : > { %3702 = vmatpush3.bf16.msra.mxu1 %v3826_v19 }
 0x772   : > { %2555 = vperm.xlu1 %3741, %v2544_v32   ;;  %3703 = vmatprep.subr.bf16.mxu1 %v3827_v17 }
 0x773   : > { %2560 = vperm.xlu0 %3740, %v2545_v45  }
 0x775   : > { %3704 = vmatpush3.bf16.msra.mxu1 %v3827_v17 }
 0x776   : > { %2565 = vperm.xlu1 %3741, %v2546_v54  }
 0x778   : > { %v3669_v48 = vpop.f32.mrb[136].mxu0 }
 0x779   : > { %v2350_v3 = vadd.f32 %v3669_v48, %v4138_v59  ;;  %v2245_v13 = vpop.f32.mrb[137].mxu0 }
 0x77a   : > { %v2348_v24 = vadd.f32 %v2245_v13, %v4123_v43  ;;  %v3670_v51 = vpop.f32.mrb[138].mxu0 }
 0x77b   : > { %v2351_v22 = vadd.f32 %v3670_v51, %v4799_v61  ;;  %v2248_v63 = vpop.f32.mrb[139].mxu0  ;;  %v2382_v46 = vmax.f32 %v2350_v3, 0.0 }
 0x77c   : > { %v2349_v55 = vadd.f32 %v2248_v63, %v4111_v38  ;;  %v2380_v53 = vmax.f32 %v2348_v24, 0.0 }
 0x77d   : > { %v2383_v50 = vmax.f32 %v2351_v22, 0.0 }
 0x77e   : > { %v2381_v10 = vmax.f32 %v2349_v55, 0.0 }
 0x77f   : > { %v4604_v39 = vpack.c.bf16 %v2383_v50, %v2382_v46 }
 0x780   : > { %v4606_v59 = vpack.c.bf16 %v2381_v10, %v2380_v53 }
 0x788   : > { %v3673_v60 = vpop.f32.mrb[140].mxu0 }
 0x789   : > { %v2354_v43 = vadd.f32 %v3673_v60, %v4181_v20  ;;  %v2261_v1 = vpop.f32.mrb[141].mxu0 }
 0x78a   : > { %v2352_v0 = vadd.f32 %v2261_v1, %v4800_v36  ;;  %v3674_v61 = vpop.f32.mrb[142].mxu0 }
 0x78b   : > { %v2355_v58 = vadd.f32 %v3674_v61, %v4801_v33  ;;  %v2264_v21 = vpop.f32.mrb[143].mxu0  ;;  %v2386_v42 = vmax.f32 %v2354_v43, 0.0 }
 0x78c   : > { %v2353_v38 = vadd.f32 %v2264_v21, %v4147_v2  ;;  %v2384_v28 = vmax.f32 %v2352_v0, 0.0 }
 0x78d   : > { %v2387_v56 = vmax.f32 %v2355_v58, 0.0 }
 0x78e   : > { %v2385_v57 = vmax.f32 %v2353_v38, 0.0 }
 0x78f   : > { %v4612_v30 = vpack.c.bf16 %v2387_v56, %v2386_v42 }
 0x790   : > { %v4614_v34 = vpack.c.bf16 %v2385_v57, %v2384_v28  ;;  %v3829_v28 = vld [vmem:[%s4697_s11] sm:$0xff]   ;;  %v3830_v57 = vld [vmem:[%s4697_s11 + $0x8] sm:$0xff]  }
 0x798   : > { %v3677_v23 = vpop.f32.mrb[144].mxu0 }
 0x799   : > { %v2358_v20 = vadd.f32 %v3677_v23, %v4058_v52  ;;  %v2277_v25 = vpop.f32.mrb[145].mxu0  ;;  %v3833_v23 = vld [vmem:[%s4697_s11 + $0x20] sm:$0xff]  }
 0x79a   : > { %v2356_v36 = vadd.f32 %v2277_v25, %v4049_v47  ;;  %v3678_v35 = vpop.f32.mrb[146].mxu0 }
 0x79b   : > { %v2359_v33 = vadd.f32 %v3678_v35, %v4802_v26  ;;  %v2280_v11 = vpop.f32.mrb[147].mxu0  ;;  %v2390_v18 = vmax.f32 %v2358_v20, 0.0  ;;  %v2504_v20 = vpop.permute.xlu0 %2503 }
 0x79c   : > { %v2357_v2 = vadd.f32 %v2280_v11, %v4053_v49  ;;  %v2388_v19 = vmax.f32 %v2356_v36, 0.0 }
 0x79d   : > { %v2391_v15 = vmax.f32 %v2359_v33, 0.0 }
 0x79e   : > { %v2389_v37 = vmax.f32 %v2357_v2, 0.0 }
 0x79f   : > { %v2417_v32 = vpack.c.bf16 %v2391_v15, %v2390_v18 }
 0x7a0   : > { %v2416_v17 = vpack.c.bf16 %v2389_v37, %v2388_v19 }
 0x7a2   : > { %3465 = vmatprep.subr.bf16.mxu0 %v2416_v17 }
 0x7a3   : > { %3466 = vmatpush3.bf16.msra.mxu0 %v4565_v62 }
 0x7a4   : > { %3467 = vmatprep.subr.bf16.mxu0 %v2417_v32 }
 0x7a7   : > { %3468 = vmatpush3.bf16.msra.mxu0 %v4559_v16 }
 0x7a8   : > { %v3681_v52 = vpop.f32.mrb[148].mxu0 }
 0x7a9   : > { %v2362_v47 = vadd.f32 %v3681_v52, %v4090_v12  ;;  %v2293_v45 = vpop.f32.mrb[149].mxu0 }
 0x7aa   : > { %v2360_v26 = vadd.f32 %v2293_v45, %v4081_v7  ;;  %v3682_v48 = vpop.f32.mrb[150].mxu0 }
 0x7ab   : > { %v2363_v49 = vadd.f32 %v3682_v48, %v4083_v8  ;;  %v2296_v54 = vpop.f32.mrb[151].mxu0  ;;  %v2394_v13 = vmax.f32 %v2362_v47, 0.0 }
 0x7ac   : > { %v2361_v3 = vadd.f32 %v2296_v54, %v4085_v9  ;;  %v2392_v51 = vmax.f32 %v2360_v26, 0.0 }
 0x7ad   : > { %v2395_v24 = vmax.f32 %v2363_v49, 0.0 }
 0x7ae   : > { %v2393_v22 = vmax.f32 %v2361_v3, 0.0 }
 0x7af   : > { %v2419_v62 = vpack.c.bf16 %v2395_v24, %v2394_v13  ;;  %v3834_v24 = vld [vmem:[%s4697_s11 + $0x28] sm:$0xff]  }
 0x7b0   : > { %v2418_v63 = vpack.c.bf16 %v2393_v22, %v2392_v51  ;;  %v3835_v51 = vld [vmem:[%s4697_s11 + $0x30] sm:$0xff]   ;;  %v3836_v22 = vld [vmem:[%s4697_s11 + $0x38] sm:$0xff]  }
 0x7b2   : > { %3469 = vmatprep.subr.bf16.mxu0 %v2418_v63 }
 0x7b3   : > { %3470 = vmatpush3.bf16.msra.mxu0 %v4588_v5 }
 0x7b4   : > { %3471 = vmatprep.subr.bf16.mxu0 %v2419_v62 }
 0x7b7   : > { %3472 = vmatpush3.bf16.msra.mxu0 %v4586_v29 }
 0x7b8   : > { %v3685_v12 = vpop.f32.mrb[152].mxu0 }
 0x7b9   : > { %v2366_v7 = vadd.f32 %v3685_v12, %v4125_v44  ;;  %v2309_v16 = vpop.f32.mrb[153].mxu0  ;;  %v3015_v12 = vld [vmem:[%s4695_s9] ss:$0 sm:$0xff] }
 0x7ba   : > { %v2364_v8 = vadd.f32 %v2309_v16, %v4115_v40  ;;  %v3686_v55 = vpop.f32.mrb[154].mxu0 }
 0x7bb   : > { %v2367_v9 = vadd.f32 %v3686_v55, %v4117_v27  ;;  %v2312_v46 = vpop.f32.mrb[155].mxu0  ;;  %v2398_v53 = vmax.f32 %v2366_v7, 0.0 }
 0x7bc   : > { %v2365_v50 = vadd.f32 %v2312_v46, %v4119_v41  ;;  %v2396_v60 = vmax.f32 %v2364_v8, 0.0  ;;  %v3024_v46 = vld [vmem:[%s4696_s10] ss:$0 sm:$0xff] }
 0x7bd   : > { %v2399_v10 = vmax.f32 %v2367_v9, 0.0 }
 0x7be   : > { %v2397_v43 = vmax.f32 %v2365_v50, 0.0 }
 0x7bf   : > { %v2421_v5 = vpack.c.bf16 %v2399_v10, %v2398_v53 }
 0x7c0   : > { %v2420_v1 = vpack.c.bf16 %v2397_v43, %v2396_v60 }
 0x7c2   : > { %3473 = vmatprep.subr.bf16.mxu0 %v2420_v1 }
 0x7c3   : > { %3474 = vmatpush3.bf16.msra.mxu0 %v4606_v59 }
 0x7c4   : > { %3475 = vmatprep.subr.bf16.mxu0 %v2421_v5 }
 0x7c7   : > { %3476 = vmatpush3.bf16.msra.mxu0 %v4604_v39 }
 0x7c8   : > { %v3689_v44 = vpop.f32.mrb[156].mxu0 }
 0x7c9   : > { %v2370_v40 = vadd.f32 %v3689_v44, %v4161_v14  ;;  %v2325_v27 = vpop.f32.mrb[157].mxu0  ;;  %v3815_v14 = vld [vmem:[%s4552_s14] ss:$8 sps:$4 sm:$0xff]  }
 0x7ca   : > { %v2368_v29 = vadd.f32 %v2325_v27, %v4151_v4  ;;  %v3690_v41 = vpop.f32.mrb[158].mxu0  ;;  %v3818_v4 = vld [vmem:[%s4552_s14 + $0x14] ss:$8 sps:$4 sm:$0xff]  }
 0x7cb   : > { %v2371_v0 = vadd.f32 %v3690_v41, %v4153_v31  ;;  %v2328_v61 = vpop.f32.mrb[159].mxu0  ;;  %v2402_v21 = vmax.f32 %v2370_v40, 0.0  ;;  %v3820_v31 = vld [vmem:[%s4552_s14 + $0x10] ss:$8 sps:$4 sm:$0xff]   ;;  %s2935_s14 = sshll.u32 %s3962_s26, 2 }
 0x7cc   : > { %v2369_v58 = vadd.f32 %v2328_v61, %v4155_v6  ;;  %v2400_v38 = vmax.f32 %v2368_v29, 0.0  ;;  %v3828_v6 = vld [vmem:[%s4694_s8 + $0x38] sm:$0xff]   ;;  %p519_p5 = scmp.lt.s32.totalorder %s2935_s14, 15 }
 0x7cd   : > { %v2403_v59 = vmax.f32 %v2371_v0, 0.0  ;;  %3705 = vmatprep.subr.bf16.mxu1 %v3828_v6 }
 0x7ce   : > { %v2401_v42 = vmax.f32 %v2369_v58, 0.0  ;;  %3706 = vmatpush3.bf16.msra.mxu1 %v3828_v6  ;;  %s4806_s14 = smov (!%p519_p5, %s2935_s14), 15 }
 0x7cf   : > { %v2423_v39 = vpack.c.bf16 %v2403_v59, %v2402_v21  ;;  %s2936_s17 = sshll.u32 %s4806_s14, 3 }
 0x7d0   : > { %v2422_v56 = vpack.c.bf16 %v2401_v42, %v2400_v38  ;;  %s522_s20 = scalar_lea.vmem %s4699_s13, %s2936_s17 }
 0x7d2   : > { %3477 = vmatprep.subr.bf16.mxu0 %v2422_v56 }
 0x7d3   : > { %3478 = vmatpush3.bf16.msra.mxu0 %v4614_v34  ;;  %v3832_v34 = vld [vmem:[%s4697_s11 + $0x18] sm:$0xff]  }
 0x7d4   : > { %3479 = vmatprep.subr.bf16.mxu0 %v2423_v39  ;;  %v3025_v39 = vld [vmem:[%s4698_s12] ss:$0 sm:$0xff] }
 0x7d7   : > { %3480 = vmatpush3.bf16.msra.mxu0 %v4612_v30  ;;  %v3831_v30 = vld [vmem:[%s4697_s11 + $0x10] sm:$0xff]  }
 0x7d8   : > { %3711 = vmatprep.subr.bf16.mxu0 %v3829_v28 }
 0x7da   : > { %2477 = vmatmul.mubr.bf16.vlgmr.msra.gmra.mrb[160].mxu0 %v3815_v14 }
 0x7db   : > { %2484 = vmatprep.mubr.bf16.mxu0 %v3818_v4  ;;  %3712 = vmatpush3.bf16.msra.mxu0 %v3829_v28 }
 0x7dc   : > { %3713 = vmatprep.subr.bf16.mxu0 %v3830_v57 }
 0x7df   : > { %3714 = vmatpush3.bf16.msra.mxu0 %v3830_v57 }
 0x7e0   : > { %3715 = vmatprep.subr.bf16.mxu0 %v3831_v30 }
 0x7e2   : > { %2485 = vmatmul.mubr.bf16.gmra.mrb[164].mxu0 %v3820_v31 }
 0x7e3   : > { %3716 = vmatpush3.bf16.msra.mxu0 %v3831_v30 }
 0x7e4   : > { %3717 = vmatprep.subr.bf16.mxu0 %v3832_v34 }
 0x7e7   : > { %3718 = vmatpush3.bf16.msra.mxu0 %v3832_v34 }
 0x7e8   : > { %3719 = vmatprep.subr.bf16.mxu0 %v3833_v23 }
 0x7e9   : > { %v2514_v37 = vpop.permute.xlu1 %2513 }
 0x7ea   : > { %v2509_v18 = vpop.permute.xlu0 %2508 }
 0x7eb   : > { %3720 = vmatpush3.bf16.msra.mxu0 %v3833_v23 }
 0x7ec   : > { %3721 = vmatprep.subr.bf16.mxu0 %v3834_v24 }
 0x7ed   : > { %v2519_v49 = vpop.permute.xlu1 %2518 }
 0x7ee   : > { %v2551_v62 = vpop.permute.xlu0 %2550 }
 0x7ef   : > { %3722 = vmatpush3.bf16.msra.mxu0 %v3834_v24  ;;  %v2574_v55 = vmul.f32 %v3015_v12, %v2551_v62 }
 0x7f0   : > { %3723 = vmatprep.subr.bf16.mxu0 %v3835_v51 }
 0x7f1   : > { %v2556_v63 = vpop.permute.xlu1 %2555 }
 0x7f2   : > { %v2561_v7 = vpop.permute.xlu0 %2560  ;;  %v2575_v60 = vmul.f32 %v3015_v12, %v2556_v63 }
 0x7f3   : > { %3724 = vmatpush3.bf16.msra.mxu0 %v3835_v51  ;;  %v2576_v8 = vmul.f32 %v3015_v12, %v2561_v7 }
 0x7f4   : > { %3725 = vmatprep.subr.bf16.mxu0 %v3836_v22 }
 0x7f5   : > { %v2566_v16 = vpop.permute.xlu1 %2565 }
 0x7f6   : > { %v2577_v50 = vmul.f32 %v3015_v12, %v2566_v16 }
 0x7f7   : > { %3726 = vmatpush3.bf16.msra.mxu0 %v3836_v22 }
 0x8ad   : > { %v3481_v25 = vpop.f32.mrb[160].mxu0 }
 0x8ae   : > { %v3482_v36 = vpop.f32.mrb[161].mxu0 }
 0x8af   : > { %v3483_v35 = vadd.f32 %v3482_v36, %v3481_v25  ;;  %v3484_v33 = vpop.f32.mrb[162].mxu0 }
 0x8b0   : > { %v3485_v11 = vpop.f32.mrb[163].mxu0 }
 0x8b1   : > { %v3486_v2 = vadd.f32 %v3485_v11, %v3484_v33  ;;  %v2521_v15 = vmul.f32 %v3483_v35, %v2504_v20 }
 0x8b3   : > { %v2522_v19 = vmul.f32 %v3486_v2, %v2509_v18 }
 0x8b5   : > { %v3487_v32 = vpop.f32.mrb[164].mxu0  ;;  %v2525_v17 = vpack.c.bf16 %v2522_v19, %v2521_v15 }
 0x8b6   : > { %v3488_v52 = vpop.f32.mrb[165].mxu0 }
 0x8b7   : > { %v3489_v47 = vadd.f32 %v3488_v52, %v3487_v32  ;;  %v3490_v45 = vpop.f32.mrb[166].mxu0  ;;  %3707 = vmatprep.mubr.bf16.mxu1 %v2525_v17 }
 0x8b8   : > { %v3491_v26 = vpop.f32.mrb[167].mxu0 }
 0x8b9   : > { %v3492_v48 = vadd.f32 %v3491_v26, %v3490_v45  ;;  %v2523_v54 = vmul.f32 %v3489_v47, %v2514_v37 }
 0x8bb   : > { %v2524_v3 = vmul.f32 %v3492_v48, %v2519_v49 }
 0x8bd   : > { %v2526_v13 = vpack.c.bf16 %v2524_v3, %v2523_v54 }
 0x8bf   : > { %3708 = vmatmul.mubr.bf16.vlgmr.msra.gmra.mrb[160].mxu1 %v2526_v13 }
 0x992   : > { %v3709_v9 = vpop.f32.mrb[160].mxu1 }
 0x993   : > { %v2669_v53 = vadd.f32 %v3709_v9, %v2576_v8  ;;  %v2660_v10 = vpop.f32.mrb[161].mxu1 }
 0x994   : > { %v2661_v43 = vadd.f32 %v2660_v10, %v2574_v55  ;;  %v3710_v5 = vpop.f32.mrb[162].mxu1 }
 0x995   : > { %v2684_v1 = vadd.f32 %v3024_v46, %v2669_v53  ;;  %v2672_v44 = vadd.f32 %v3710_v5, %v2577_v50  ;;  %v2663_v40 = vpop.f32.mrb[163].mxu1 }
 0x996   : > { %v2682_v27 = vadd.f32 %v3024_v46, %v2661_v43  ;;  %v2664_v29 = vadd.f32 %v2663_v40, %v2575_v60 }
 0x997   : > { %v2685_v41 = vadd.f32 %v3024_v46, %v2672_v44  ;;  %v2688_v61 = vmax.f32 %v2684_v1, 0.0 }
 0x998   : > { %v2683_v0 = vadd.f32 %v3024_v46, %v2664_v29  ;;  %v2686_v21 = vmax.f32 %v2682_v27, 0.0 }
 0x999   : > { %v2689_v58 = vmax.f32 %v2685_v41, 0.0 }
 0x99a   : > { %v2687_v59 = vmax.f32 %v2683_v0, 0.0 }
 0x99b   : > { %v2691_v38 = vpack.c.bf16 %v2689_v58, %v2688_v61 }
 0x99c   : > { %v2690_v42 = vpack.c.bf16 %v2687_v59, %v2686_v21 }
 0x99e   : > { %3727 = vmatprep.mubr.bf16.mxu0 %v2690_v42 }
 0x99f   : > { %3728 = vmatmul.mubr.bf16.vlgmr.msra.gmra.mrb[168].mxu0 %v2691_v38 }
 0xa72   : > { %v3729_v56 = vpop.f32.mrb[168].mxu0 }
 0xa73   : > { %v2806_v14 = vadd.f32 %v3729_v56, %v3025_v39  ;;  %v2797_v4 = vpop.f32.mrb[169].mxu0 }
 0xa74   : > { %v2798_v31 = vadd.f32 %v3025_v39, %v2797_v4  ;;  %v3730_v6 = vpop.f32.mrb[170].mxu0 }
 0xa75   : > { %2814 = vst [vmem:[%s522_s20 + $0x10] sm:$0xff] %v2806_v14  ;;  %v2809_v28 = vadd.f32 %v3730_v6, %v3025_v39  ;;  %v2800_v57 = vpop.f32.mrb[171].mxu0 }
 0xa76   : > { %2812 = vst [vmem:[%s522_s20] sm:$0xff] %v2798_v31  ;;  %v2801_v30 = vadd.f32 %v3025_v39, %v2800_v57 }
 0xa77   : > { %2815 = vst [vmem:[%s522_s20 + $0x18] sm:$0xff] %v2809_v28 }
 0xa78   : > { %2813 = vst [vmem:[%s522_s20 + $0x8] sm:$0xff] %v2801_v30 }
 0xa79 PF: > { %s23_s25 = sadd.s32 1, %s3883_s25  }
 0xa7a   : > { %p20_p6 = scmp.ge.s32.totalorder %s23_s25, 6  }
 0xa7c   :  { %22 = sbr.rel (!%p20_p6) target bundleno = 1 (0x1), region = 114 }

</bundles_post_ra>
